<compile_context>
chip_gen: v7x
topology: tpu7x:2x2x1
jax: 0.10.0
libtpu: 0.0.40
codegen_flags: <defaults>
</compile_context>

<pallas_src>
import jax
import jax.numpy as jnp
from jax import lax
from jax.experimental import pallas as pl
from jax.experimental.pallas import tpu as pltpu


def _round_up(x, m):
    return ((x + m - 1) // m) * m


def _netone_kernel(idx_ref, hl_ref, rl_ref, out_ref):
    """Fused gather(tanh(table)) + dist() for the positive & negative triples.

    idx_ref : (6, Bt) int32   rows = [h, r, t, h_, r_, t_]
    hl_ref  : (V, D)  f32     entity embedding table (resident in VMEM)
    rl_ref  : (R, D)  f32     relation embedding table (resident in VMEM)
    out_ref : (2, Bt) f32     row 0 = dist(pos), row 1 = dist(neg)
    """
    bt = idx_ref.shape[1]
    v_rows = hl_ref.shape[0]
    r_rows = rl_ref.shape[0]

    # Activate the (tiny) tables once; exact since gather is a row selection.
    hl = jnp.tanh(hl_ref[...])            # (V, D)
    rl = jnp.tanh(rl_ref[...])            # (R, D)

    def gather_t(table, n_rows, row):
        # Exact one-hot gather on the MXU, producing a (D, Bt) slab
        # (embedding dim on sublanes, batch on lanes -> lane-dense reductions).
        idx = idx_ref[row:row + 1, :]                                  # (1, Bt)
        iota = lax.broadcasted_iota(jnp.int32, (n_rows, bt), 0)        # (V, Bt)
        onehot = (iota == idx).astype(table.dtype)                     # (V, Bt)
        return lax.dot_general(
            table, onehot,
            dimension_numbers=(((0,), (0,)), ((), ())),                # (D, Bt)
            preferred_element_type=jnp.float32,
            precision=lax.Precision.HIGHEST)

    h = gather_t(hl, v_rows, 0)
    r = gather_t(rl, r_rows, 1)
    t = gather_t(hl, v_rows, 2)
    h_ = gather_t(hl, v_rows, 3)
    r_ = gather_t(rl, r_rows, 4)
    t_ = gather_t(hl, v_rows, 5)

    def dist(h, r, t):
        # ||.||_2 per column; the two dot terms share a single reduction.
        nh = jnp.sqrt(jnp.sum(h * h, axis=0, keepdims=True))
        nr = jnp.sqrt(jnp.sum(r * r, axis=0, keepdims=True))
        nt = jnp.sqrt(jnp.sum(t * t, axis=0, keepdims=True))
        cross = jnp.sum(h * t + r * (t - h), axis=0, keepdims=True)
        return nh + nr + nt - 2.0 * cross                              # (1, Bt)

    # Single lane-dense store: (2, Bt) slab.
    out_ref[...] = jnp.concatenate([dist(h, r, t), dist(h_, r_, t_)], axis=0)


def netone_forward(hl_table, rl_table, x, x_):
    """Pallas forward. x, x_ are (h_idx, r_idx, t_idx) int vectors of shape (B,)."""
    h_idx, r_idx, t_idx = x
    hn_idx, rn_idx, tn_idx = x_
    b = h_idx.shape[0]
    v_rows, d = hl_table.shape
    r_rows = rl_table.shape[0]

    # Pad batch to a lane-dense multiple of 128; tile the batch axis.
    b_pad = _round_up(max(b, 1), 128)
    tile_b = next(t for t in (1024, 512, 256, 128) if b_pad % t == 0)
    num_tiles = b_pad // tile_b

    idx = jnp.stack([h_idx, r_idx, t_idx, hn_idx, rn_idx, tn_idx]).astype(jnp.int32)
    idx = jnp.pad(idx, ((0, 0), (0, b_pad - b)))   # padded lanes gather row 0

    cost = pl.CostEstimate(
        flops=int(2 * d * b_pad * (4 * v_rows + 2 * r_rows) + 16 * d * b_pad),
        transcendentals=int(num_tiles * (v_rows + r_rows) * d + 6 * b_pad),
        bytes_accessed=int(4 * (6 * b_pad + num_tiles * (v_rows + r_rows) * d
                                + 2 * b_pad)),
    )

    out = pl.pallas_call(
        _netone_kernel,
        out_shape=jax.ShapeDtypeStruct((2, b_pad), jnp.float32),
        grid=(num_tiles,),
        in_specs=[
            pl.BlockSpec((6, tile_b), lambda i: (0, i)),        # index slab, tiled on B
            pl.BlockSpec((v_rows, d), lambda i: (0, 0)),        # entity table, resident
            pl.BlockSpec((r_rows, d), lambda i: (0, 0)),        # relation table, resident
        ],
        out_specs=pl.BlockSpec((2, tile_b), lambda i: (0, i)),  # lane-dense output
        compiler_params=pltpu.CompilerParams(
            dimension_semantics=("parallel",)),
        cost_estimate=cost,
    )(idx, hl_table, rl_table)

    return out[0, :b], out[1, :b]


class NetOnePallas:
    """JAX/Pallas equivalent of the PyTorch NetOne module (act_fun = tanh)."""

    def __init__(self, dim, vocab_dim, relation_dim, key):
        k1, k2 = jax.random.split(key)
        # nn.Embedding default init: N(0, 1).  (bf16 storage would halve HBM
        # traffic on v6e/v7x for large tables; kept f32 here for exactness.)
        self.hl = jax.random.normal(k1, (vocab_dim, dim), dtype=jnp.float32)
        self.rl = jax.random.normal(k2, (relation_dim, dim), dtype=jnp.float32)

    def __call__(self, x, x_):
        return netone_forward(self.hl, self.rl, x, x_)


def _reference(net, x, x_):
    def dist(h, r, t):
        res = (jnp.linalg.norm(h, axis=1) + jnp.linalg.norm(r, axis=1)
               + jnp.linalg.norm(t, axis=1))
        ht = jnp.sum(h * t, axis=1)
        rth = jnp.sum(r * (t - h), axis=1)
        return res - 2.0 * (ht + rth)

    h_idx, r_idx, t_idx = x
    hn_idx, rn_idx, tn_idx = x_
    h = jnp.tanh(jnp.take(net.hl, h_idx, axis=0))
    r = jnp.tanh(jnp.take(net.rl, r_idx, axis=0))
    t = jnp.tanh(jnp.take(net.hl, t_idx, axis=0))
    h_ = jnp.tanh(jnp.take(net.hl, hn_idx, axis=0))
    r_ = jnp.tanh(jnp.take(net.rl, rn_idx, axis=0))
    t_ = jnp.tanh(jnp.take(net.hl, tn_idx, axis=0))
    return dist(h, r, t), dist(h_, r_, t_)


if __name__ == "__main__":
    key = jax.random.PRNGKey(0)
    k_params, k_h, k_r, k_t, k_hn, k_rn, k_tn = jax.random.split(key, 7)

    dim = 32
    vocab_dim = 50
    relation_dim = 10
    batch = 8

    net = NetOnePallas(dim, vocab_dim, relation_dim, k_params)

    x = (jax.random.randint(k_h, (batch,), 0, vocab_dim),
         jax.random.randint(k_r, (batch,), 0, relation_dim),
         jax.random.randint(k_t, (batch,), 0, vocab_dim))
    x_ = (jax.random.randint(k_hn, (batch,), 0, vocab_dim),
          jax.random.randint(k_rn, (batch,), 0, relation_dim),
          jax.random.randint(k_tn, (batch,), 0, vocab_dim))

    pos, neg = net(x, x_)
    pos = jax.block_until_ready(pos)
    neg = jax.block_until_ready(neg)

    ref_pos, ref_neg = _reference(net, x, x_)
    assert pos.shape == (batch,) and neg.shape == (batch,)
    assert jnp.allclose(pos, ref_pos, atol=1e-4, rtol=1e-4), (pos, ref_pos)
    assert jnp.allclose(neg, ref_neg, atol=1e-4, rtol=1e-4), (neg, ref_neg)

    print("KERNEL_OK")
</pallas_src>

<mosaic_0001>
module attributes {stable_mosaic.version = 11 : i64} {
  func.func @_netone_kernel(%arg0: i32, %arg1: memref<6x128xi32, #tpu.memory_space<vmem>>, %arg2: memref<50x32xf32, #tpu.memory_space<vmem>>, %arg3: memref<10x32xf32, #tpu.memory_space<vmem>>, %arg4: memref<2x128xf32, #tpu.memory_space<vmem>>) attributes {dimension_semantics = [#tpu.dimension_semantics<parallel>], iteration_bounds = array<i64: 1>, scalar_prefetch = 0 : i64, scratch_operands = 0 : i64, tpu.core_type = #tpu.core_type<tc>, window_params = [{transform_indices = @transform_0, window_bounds = array<i64: 6, 128>}, {pipeline_mode = #tpu.pipeline_mode<synchronous>, transform_indices = @transform_1, window_bounds = array<i64: 50, 32>}, {pipeline_mode = #tpu.pipeline_mode<synchronous>, transform_indices = @transform_2, window_bounds = array<i64: 10, 32>}, {transform_indices = @transform_3, window_bounds = array<i64: 2, 128>}]} {
    %c0 = arith.constant 0 : index
    %c0_0 = arith.constant 0 : index
    %0 = vector.load %arg2[%c0, %c0_0] : memref<50x32xf32, #tpu.memory_space<vmem>>, vector<50x32xf32>
    %1 = math.tanh %0 : vector<50x32xf32>
    %c0_1 = arith.constant 0 : index
    %c0_2 = arith.constant 0 : index
    %2 = vector.load %arg3[%c0_1, %c0_2] : memref<10x32xf32, #tpu.memory_space<vmem>>, vector<10x32xf32>
    %3 = math.tanh %2 : vector<10x32xf32>
    %c0_3 = arith.constant 0 : index
    %c0_4 = arith.constant 0 : index
    %4 = vector.load %arg1[%c0_3, %c0_4] : memref<6x128xi32, #tpu.memory_space<vmem>>, vector<1x128xi32>
    %5 = tpu.iota {dimensions = array<i32: 0>} : vector<50x128xi32>
    %6 = vector.broadcast %4 : vector<1x128xi32> to vector<50x128xi32>
    %7 = arith.cmpi eq, %5, %6 : vector<50x128xi32>
    %8 = arith.extui %7 : vector<50x128xi1> to vector<50x128xi32>
    %9 = arith.sitofp %8 : vector<50x128xi32> to vector<50x128xf32>
    %cst = arith.constant dense<0.000000e+00> : vector<32x128xf32>
    %10 = tpu.matmul %1, %9, %cst {dimension_numbers = #tpu.dot_dimension_numbers<[0], [0], [1], [1], [0, 1, 1, 1], [], []>, precision = #tpu.contract_precision<fp32>} : vector<50x32xf32>, vector<50x128xf32>, vector<32x128xf32> -> vector<32x128xf32>
    %c1 = arith.constant 1 : index
    %c0_5 = arith.constant 0 : index
    %11 = vector.load %arg1[%c1, %c0_5] : memref<6x128xi32, #tpu.memory_space<vmem>>, vector<1x128xi32>
    %12 = tpu.iota {dimensions = array<i32: 0>} : vector<10x128xi32>
    %13 = vector.broadcast %11 : vector<1x128xi32> to vector<10x128xi32>
    %14 = arith.cmpi eq, %12, %13 : vector<10x128xi32>
    %15 = arith.extui %14 : vector<10x128xi1> to vector<10x128xi32>
    %16 = arith.sitofp %15 : vector<10x128xi32> to vector<10x128xf32>
    %cst_6 = arith.constant dense<0.000000e+00> : vector<32x128xf32>
    %17 = tpu.matmul %3, %16, %cst_6 {dimension_numbers = #tpu.dot_dimension_numbers<[0], [0], [1], [1], [0, 1, 1, 1], [], []>, precision = #tpu.contract_precision<fp32>} : vector<10x32xf32>, vector<10x128xf32>, vector<32x128xf32> -> vector<32x128xf32>
    %c2 = arith.constant 2 : index
    %c0_7 = arith.constant 0 : index
    %18 = vector.load %arg1[%c2, %c0_7] : memref<6x128xi32, #tpu.memory_space<vmem>>, vector<1x128xi32>
    %19 = tpu.iota {dimensions = array<i32: 0>} : vector<50x128xi32>
    %20 = vector.broadcast %18 : vector<1x128xi32> to vector<50x128xi32>
    %21 = arith.cmpi eq, %19, %20 : vector<50x128xi32>
    %22 = arith.extui %21 : vector<50x128xi1> to vector<50x128xi32>
    %23 = arith.sitofp %22 : vector<50x128xi32> to vector<50x128xf32>
    %cst_8 = arith.constant dense<0.000000e+00> : vector<32x128xf32>
    %24 = tpu.matmul %1, %23, %cst_8 {dimension_numbers = #tpu.dot_dimension_numbers<[0], [0], [1], [1], [0, 1, 1, 1], [], []>, precision = #tpu.contract_precision<fp32>} : vector<50x32xf32>, vector<50x128xf32>, vector<32x128xf32> -> vector<32x128xf32>
    %c3 = arith.constant 3 : index
    %c0_9 = arith.constant 0 : index
    %25 = vector.load %arg1[%c3, %c0_9] : memref<6x128xi32, #tpu.memory_space<vmem>>, vector<1x128xi32>
    %26 = tpu.iota {dimensions = array<i32: 0>} : vector<50x128xi32>
    %27 = vector.broadcast %25 : vector<1x128xi32> to vector<50x128xi32>
    %28 = arith.cmpi eq, %26, %27 : vector<50x128xi32>
    %29 = arith.extui %28 : vector<50x128xi1> to vector<50x128xi32>
    %30 = arith.sitofp %29 : vector<50x128xi32> to vector<50x128xf32>
    %cst_10 = arith.constant dense<0.000000e+00> : vector<32x128xf32>
    %31 = tpu.matmul %1, %30, %cst_10 {dimension_numbers = #tpu.dot_dimension_numbers<[0], [0], [1], [1], [0, 1, 1, 1], [], []>, precision = #tpu.contract_precision<fp32>} : vector<50x32xf32>, vector<50x128xf32>, vector<32x128xf32> -> vector<32x128xf32>
    %c4 = arith.constant 4 : index
    %c0_11 = arith.constant 0 : index
    %32 = vector.load %arg1[%c4, %c0_11] : memref<6x128xi32, #tpu.memory_space<vmem>>, vector<1x128xi32>
    %33 = tpu.iota {dimensions = array<i32: 0>} : vector<10x128xi32>
    %34 = vector.broadcast %32 : vector<1x128xi32> to vector<10x128xi32>
    %35 = arith.cmpi eq, %33, %34 : vector<10x128xi32>
    %36 = arith.extui %35 : vector<10x128xi1> to vector<10x128xi32>
    %37 = arith.sitofp %36 : vector<10x128xi32> to vector<10x128xf32>
    %cst_12 = arith.constant dense<0.000000e+00> : vector<32x128xf32>
    %38 = tpu.matmul %3, %37, %cst_12 {dimension_numbers = #tpu.dot_dimension_numbers<[0], [0], [1], [1], [0, 1, 1, 1], [], []>, precision = #tpu.contract_precision<fp32>} : vector<10x32xf32>, vector<10x128xf32>, vector<32x128xf32> -> vector<32x128xf32>
    %c5 = arith.constant 5 : index
    %c0_13 = arith.constant 0 : index
    %39 = vector.load %arg1[%c5, %c0_13] : memref<6x128xi32, #tpu.memory_space<vmem>>, vector<1x128xi32>
    %40 = tpu.iota {dimensions = array<i32: 0>} : vector<50x128xi32>
    %41 = vector.broadcast %39 : vector<1x128xi32> to vector<50x128xi32>
    %42 = arith.cmpi eq, %40, %41 : vector<50x128xi32>
    %43 = arith.extui %42 : vector<50x128xi1> to vector<50x128xi32>
    %44 = arith.sitofp %43 : vector<50x128xi32> to vector<50x128xf32>
    %cst_14 = arith.constant dense<0.000000e+00> : vector<32x128xf32>
    %45 = tpu.matmul %1, %44, %cst_14 {dimension_numbers = #tpu.dot_dimension_numbers<[0], [0], [1], [1], [0, 1, 1, 1], [], []>, precision = #tpu.contract_precision<fp32>} : vector<50x32xf32>, vector<50x128xf32>, vector<32x128xf32> -> vector<32x128xf32>
    %46 = arith.mulf %10, %10 : vector<32x128xf32>
    %cst_15 = arith.constant dense<0.000000e+00> : vector<128xf32>
    %47 = vector.multi_reduction <add>, %46, %cst_15 [0] : vector<32x128xf32> to vector<128xf32>
    %48 = vector.shape_cast %47 : vector<128xf32> to vector<1x128xf32>
    %49 = math.sqrt %48 : vector<1x128xf32>
    %50 = arith.mulf %17, %17 : vector<32x128xf32>
    %cst_16 = arith.constant dense<0.000000e+00> : vector<128xf32>
    %51 = vector.multi_reduction <add>, %50, %cst_16 [0] : vector<32x128xf32> to vector<128xf32>
    %52 = vector.shape_cast %51 : vector<128xf32> to vector<1x128xf32>
    %53 = math.sqrt %52 : vector<1x128xf32>
    %54 = arith.mulf %24, %24 : vector<32x128xf32>
    %cst_17 = arith.constant dense<0.000000e+00> : vector<128xf32>
    %55 = vector.multi_reduction <add>, %54, %cst_17 [0] : vector<32x128xf32> to vector<128xf32>
    %56 = vector.shape_cast %55 : vector<128xf32> to vector<1x128xf32>
    %57 = math.sqrt %56 : vector<1x128xf32>
    %58 = arith.mulf %10, %24 : vector<32x128xf32>
    %59 = arith.subf %24, %10 : vector<32x128xf32>
    %60 = arith.mulf %17, %59 : vector<32x128xf32>
    %61 = arith.addf %58, %60 : vector<32x128xf32>
    %cst_18 = arith.constant dense<0.000000e+00> : vector<128xf32>
    %62 = vector.multi_reduction <add>, %61, %cst_18 [0] : vector<32x128xf32> to vector<128xf32>
    %63 = vector.shape_cast %62 : vector<128xf32> to vector<1x128xf32>
    %64 = arith.addf %49, %53 : vector<1x128xf32>
    %65 = arith.addf %64, %57 : vector<1x128xf32>
    %cst_19 = arith.constant 2.000000e+00 : f32
    %66 = vector.broadcast %cst_19 : f32 to vector<1x128xf32>
    %67 = arith.mulf %66, %63 : vector<1x128xf32>
    %68 = arith.subf %65, %67 : vector<1x128xf32>
    %69 = arith.mulf %31, %31 : vector<32x128xf32>
    %cst_20 = arith.constant dense<0.000000e+00> : vector<128xf32>
    %70 = vector.multi_reduction <add>, %69, %cst_20 [0] : vector<32x128xf32> to vector<128xf32>
    %71 = vector.shape_cast %70 : vector<128xf32> to vector<1x128xf32>
    %72 = math.sqrt %71 : vector<1x128xf32>
    %73 = arith.mulf %38, %38 : vector<32x128xf32>
    %cst_21 = arith.constant dense<0.000000e+00> : vector<128xf32>
    %74 = vector.multi_reduction <add>, %73, %cst_21 [0] : vector<32x128xf32> to vector<128xf32>
    %75 = vector.shape_cast %74 : vector<128xf32> to vector<1x128xf32>
    %76 = math.sqrt %75 : vector<1x128xf32>
    %77 = arith.mulf %45, %45 : vector<32x128xf32>
    %cst_22 = arith.constant dense<0.000000e+00> : vector<128xf32>
    %78 = vector.multi_reduction <add>, %77, %cst_22 [0] : vector<32x128xf32> to vector<128xf32>
    %79 = vector.shape_cast %78 : vector<128xf32> to vector<1x128xf32>
    %80 = math.sqrt %79 : vector<1x128xf32>
    %81 = arith.mulf %31, %45 : vector<32x128xf32>
    %82 = arith.subf %45, %31 : vector<32x128xf32>
    %83 = arith.mulf %38, %82 : vector<32x128xf32>
    %84 = arith.addf %81, %83 : vector<32x128xf32>
    %cst_23 = arith.constant dense<0.000000e+00> : vector<128xf32>
    %85 = vector.multi_reduction <add>, %84, %cst_23 [0] : vector<32x128xf32> to vector<128xf32>
    %86 = vector.shape_cast %85 : vector<128xf32> to vector<1x128xf32>
    %87 = arith.addf %72, %76 : vector<1x128xf32>
    %88 = arith.addf %87, %80 : vector<1x128xf32>
    %cst_24 = arith.constant 2.000000e+00 : f32
    %89 = vector.broadcast %cst_24 : f32 to vector<1x128xf32>
    %90 = arith.mulf %89, %86 : vector<1x128xf32>
    %91 = arith.subf %88, %90 : vector<1x128xf32>
    %92 = tpu.concatenate %68, %91 in 0 : vector<1x128xf32>, vector<1x128xf32> -> vector<2x128xf32>
    %c0_25 = arith.constant 0 : index
    %c0_26 = arith.constant 0 : index
    %93 = vector.load %arg4[%c0_25, %c0_26] : memref<2x128xf32, #tpu.memory_space<vmem>>, vector<2x128xf32>
    tpu.vector_store %arg4[%c0_25, %c0_26], %92 {strides = array<i32>} : memref<2x128xf32, #tpu.memory_space<vmem>>, vector<2x128xf32>,
    return
  }
  func.func @transform_0(%arg0: i32) -> (i32, i32) {
    %c0_i32 = arith.constant 0 : i32
    %c0_i32_0 = arith.constant 0 : i32
    return %c0_i32, %arg0 : i32, i32
  }
  func.func @transform_1(%arg0: i32) -> (i32, i32) {
    %c0_i32 = arith.constant 0 : i32
    %c0_i32_0 = arith.constant 0 : i32
    %c0_i32_1 = arith.constant 0 : i32
    return %c0_i32, %c0_i32_0 : i32, i32
  }
  func.func @transform_2(%arg0: i32) -> (i32, i32) {
    %c0_i32 = arith.constant 0 : i32
    %c0_i32_0 = arith.constant 0 : i32
    %c0_i32_1 = arith.constant 0 : i32
    return %c0_i32, %c0_i32_0 : i32, i32
  }
  func.func @transform_3(%arg0: i32) -> (i32, i32) {
    %c0_i32 = arith.constant 0 : i32
    %c0_i32_0 = arith.constant 0 : i32
    return %c0_i32, %arg0 : i32, i32
  }
}

</mosaic_0001>

<bundles_post_ra>
// kernel: tpu_custom_call.1
= control target key start
LH: loop header
LB: loop body
LE: loop exit
PB: predicated region body
PF: predicated region fallthrough
CT: control target
= control target key end

     0   :  { %v34_v2 = vlaneseq  ;;  %s7223_s0 = inlined_call_operand.vmem [shape: s32[6,128], index: 0, kind: input, shape index: {}]   ;;  %s7224_s1 = inlined_call_operand.vmem [shape: f32[50,32], index: 1, kind: input, shape index: {}]   ;;  %s7225_s2 = inlined_call_operand.vmem [shape: f32[10,32], index: 2, kind: input, shape index: {}]   ;;  %s7226_s3 = inlined_call_operand.hbm [shape: f32[2,128], index: 3, kind: output, shape index: {}]  }
   0x1   :  { %v15_v0 = vld [vmem:[%s7224_s1] sm:$0xff]  ;;  %v16_v1 = vld [vmem:[%s7224_s1 + $0x8] sm:$0xff]  ;;  %v17_v5 = vld [vmem:[%s7224_s1 + $0x10] sm:$0xff] }
   0x2   :  { %5809 = vtanh.f32 %v15_v0  ;;  %v29_v3 = vld [vmem:[%s7225_s2] sm:$0xff]  ;;  %v5896_v4 = vshrl.u32 %v34_v2, 7 }
   0x3   :  { %5811 = vtanh.f32 %v16_v1  ;;  %v5904_v6 = vld [vmem:[%s7223_s0] ss:$0 sm:$0xff] }
   0x4   :  { %8 = vsyncpa [#allocation3], 0  ;;  %v30_v7 = vld [vmem:[%s7225_s2 + $0x8] sm:$0x3]  ;;  %v5910_v8 = vadd.s32 8, %v5896_v4  ;;  %vm46_vm0 = vcmp.eq.s32.totalorder %v5896_v4, %v5904_v6  ;;  %v5915_v9 = vadd.s32 16, %v5896_v4  ;;  %5813 = vtanh.f32 %v29_v3 }
   0x5   :  { %v7231_v10 = vmov 0.0   ;;  %v5922_v12 = vadd.s32 24, %v5896_v4  ;;  %5815 = vtanh.f32 %v17_v5  ;;  %v18_v16 = vld [vmem:[%s7224_s1 + $0x18] sm:$0xff]  ;;  %v5951_v21 = vadd.s32 32, %v5896_v4  ;;  %v19_v26 = vld [vmem:[%s7224_s1 + $0x20] sm:$0xff]  ;;  %v20_v39 = vld [vmem:[%s7224_s1 + $0x28] sm:$0xff] }
   0x6   :  { %v4260_v11 = vsel %vm46_vm0, 1.0, %v7231_v10  ;;  %vm47_vm1 = vcmp.eq.s32.totalorder %v5910_v8, %v5904_v6  ;;  %vm48_vm2 = vcmp.eq.s32.totalorder %v5915_v9, %v5904_v6  ;;  %5817 = vtanh.f32 %v30_v7  ;;  %v21_v44 = vld [vmem:[%s7224_s1 + $0x30] sm:$0x3] }
   0x7   :  { %v5926_v13 = vsub.f32 %v4260_v11, %v4260_v11  ;;  %v4261_v14 = vsel %vm47_vm1, 1.0, %v7231_v10  ;;  %vm49_vm3 = vcmp.eq.s32.totalorder %v5922_v12, %v5904_v6  ;;  %v4262_v15 = vsel %vm48_vm2, 1.0, %v7231_v10  ;;  %vm5959_vm4 = vmpackc.low %vm47_vm1, %vm46_vm0 }
   0x8   :  { %v5940_v17 = vsub.f32 %v4261_v14, %v4261_v14  ;;  %v4263_v18 = vsel %vm49_vm3, 1.0, %v7231_v10  ;;  %v5946_v19 = vsub.f32 %v4262_v15, %v4262_v15  ;;  %v5954_v22 = vadd.s32 40, %v5896_v4  ;;  %vm6011_vm9 = vmpackc.low %vm49_vm3, %vm48_vm2 }
   0x9   :  { %v5948_v20 = vsub.f32 %v4263_v18, %v4263_v18  ;;  %5819 = vtanh.f32 %v18_v16  ;;  %vm50_vm5 = vcmp.eq.s32.totalorder %v5951_v21, %v5904_v6  ;;  %v5983_v30 = vadd.s32 48, %v5896_v4 }
   0xa   :  { %v5353_v24 = vpack.c.bf16 %v5940_v17, %v5926_v13  ;;  %vm51_vm6 = vcmp.eq.s32.totalorder %v5954_v22, %v5904_v6  ;;  %v4264_v28 = vsel %vm50_vm5, 1.0, %v7231_v10  ;;  %v7241_v32 = vmov 1.0|1.0  }
   0xb   :  { %v5357_v27 = vpack.c.bf16 %v5948_v20, %v5946_v19  ;;  %v4265_v29 = vsel %vm51_vm6, 1.0, %v7231_v10  ;;  %5330 = vmatprep.subr.msk.bf16.mxu1 %vm5959_vm4, %v7241_v32  ;;  %v5988_v33 = vsub.f32 %v4264_v28, %v4264_v28  ;;  %vm52_vm7 = vcmp.eq.s32.totalorder %v5983_v30, %v5904_v6  ;;  %vm6034_vm10 = vmpackc.low %vm51_vm6, %vm50_vm5 }
   0xc   :  { %v5810_v25 = vpop.eup %5809  ;;  %5354 = vmatprep.subr.bf16.mxu0 %v5353_v24  ;;  %v5990_v34 = vsub.f32 %v4265_v29, %v4265_v29  ;;  %5332 = vmatpush3.bf16.msk.msra.mxu1 %vm5959_vm4, %v7241_v32  ;;  %5821 = vtanh.f32 %v19_v26  ;;  %v6000_v37 = vsel %vm52_vm7, 1.0, %v7231_v10  ;;  %vm112_vm8 = vcmask 1041408  }
   0xd   :  { %67 = vxpose.xlu0.b32.start [1/7] (short) (narrow) %v5810_v25, 32  ;;  %v5812_v31 = vpop.eup %5811  ;;  %5356 = vmatpush3.bf16.msra.mxu0 %v5353_v24  ;;  %v114_v41 = vsel %vm112_vm8, %v6000_v37, 0  ;;  %5823 = vtanh.f32 %v20_v39  ;;  %v231_v46 = vand.u32 4294901760, %v5926_v13  ;;  %v238_v47 = vand.u32 4294901760, %v5940_v17 }
   0xe   :  { %5358 = vmatprep.subr.bf16.mxu0 %v5357_v27  ;;  %v5814_v35 = vpop.eup %5813  ;;  %v5361_v36 = vpack.c.bf16 %v5990_v34, %v5988_v33  ;;  %5334 = vmatprep.subr.msk.bf16.mxu1 %vm6011_vm9, %v7241_v32  ;;  %v6023_v43 = vsub.f32 %v114_v41, %v114_v41  ;;  %5825 = vtanh.f32 %v21_v44  ;;  %v245_v53 = vand.u32 4294901760, %v5946_v19 }
   0xf   :  { %v5816_v38 = vpop.eup %5815  ;;  %780 = vxpose.xlu1.b32.start [1/2] (short) (narrow) %v5814_v35, 32  ;;  %v232_v49 = vsub.f32 %v5926_v13, %v231_v46  ;;  %v239_v50 = vsub.f32 %v5940_v17, %v238_v47  ;;  %v252_v54 = vand.u32 4294901760, %v5948_v20  ;;  %v259_v61 = vand.u32 4294901760, %v5988_v33  ;;  %v6082_v17 = vld [vmem:[%s7223_s0 + $0x1] ss:$0 sm:$0xff] }
  0x10   :  { %v5818_v42 = vpop.eup %5817  ;;  %5336 = vmatpush3.bf16.msk.msra.mxu1 %vm6011_vm9, %v7241_v32  ;;  %v246_v57 = vsub.f32 %v5946_v19, %v245_v53  ;;  %v266_v62 = vand.u32 4294901760, %v5990_v34  ;;  %v6072_v11 = vpack.c.bf16 %v238_v47, %v231_v46  ;;  %vm99_vm11 = vcmask 408576  }
  0x11   :  { %68 = vxpose.xlu0.b32.cont [2/7] (short) (narrow) %v5812_v31, 32  ;;  %5360 = vmatpush3.bf16.msra.mxu0 %v5357_v27  ;;  %v233_v51 = vand.u32 4294901760, %v232_v49  ;;  %v240_v52 = vand.u32 4294901760, %v239_v50  ;;  %v253_v58 = vsub.f32 %v5948_v20, %v252_v54  ;;  %v260_v1 = vsub.f32 %v5988_v33, %v259_v61 }
  0x12   :  { %5362 = vmatprep.subr.bf16.mxu0 %v5361_v36  ;;  %5338 = vmatprep.subr.msk.bf16.mxu1 %vm6034_vm10, %v7241_v32  ;;  %v247_v59 = vand.u32 4294901760, %v246_v57  ;;  %v267_v2 = vsub.f32 %v5990_v34, %v266_v62  ;;  %v6074_v13 = vpack.c.bf16 %v252_v54, %v245_v53  ;;  %v6076_v14 = vpack.c.bf16 %v266_v62, %v259_v61 }
  0x13   :  { %781 = vxpose.xlu1.b32.end [2/2] (short) (narrow) %v5818_v42, 32  ;;  %v5820_v48 = vpop.eup %5819  ;;  %v6059_v56 = vpack.c.bf16 %v240_v52, %v233_v51  ;;  %v254_v60 = vand.u32 4294901760, %v253_v58  ;;  %v261_v3 = vand.u32 4294901760, %v260_v1  ;;  %vm775_vm12 = vcmp.eq.s32.totalorder %v5910_v8, %v6082_v17 }
  0x14   :  { %5340 = vmatpush3.bf16.msk.msra.mxu1 %vm6034_vm10, %v7241_v32  ;;  %v268_v5 = vand.u32 4294901760, %v267_v2  ;;  %vm774_vm13 = vcmp.eq.s32.totalorder %v5896_v4, %v6082_v17  ;;  %v6101_v28 = vsel %vm775_vm12, 1.0, %v7231_v10  ;;  %vm812_vm14 = vcmask 80896  }
  0x15   :  { %69 = vxpose.xlu0.b32.cont [3/7] (short) (narrow) %v5816_v38, 32  ;;  %5364 = vmatpush3.bf16.msra.mxu0 %v5361_v36  ;;  %v6066_v0 = vpack.c.bf16 %v254_v60, %v247_v59  ;;  %v4289_v36 = vsel %vm774_vm13, 1.0, %v7231_v10  ;;  %v826_v42 = vsel %vm112_vm8, %v6101_v28, 0  ;;  %v6153_v57 = vand.u32 4294901760, %v6023_v43  ;;  %vm6237_vm15 = vmpackc.low %vm112_vm8, %vm774_vm13 }
  0x16   :  { %4781 = vmatprep.subr.mxu0 %v6023_v43  ;;  %4741 = vmatprep.subr.msk.mxu1 %vm112_vm8, %v6000_v37  ;;  %v5822_v55 = vpop.eup %5821  ;;  %v6070_v7 = vpack.c.bf16 %v268_v5, %v261_v3  ;;  %v6136_v49 = vsub.f32 %v4289_v36, %v4289_v36  ;;  %v6138_v50 = vsub.f32 %v826_v42, %v826_v42 }
  0x17   :  { %v5824_v63 = vpop.eup %5823 }
  0x18   :  { %4742 = vmatpush3.msk.msra.mxu1 %vm112_vm8, %v6000_v37  ;;  %v5826_v6 = vpop.eup %5825  ;;  %v938_v60 = vand.u32 4294901760, %v6136_v49  ;;  %v945_v61 = vand.u32 4294901760, %v6138_v50 }
  0x19   :  { %70 = vxpose.xlu0.b32.cont [4/7] (short) (narrow) %v5820_v48, 32  ;;  %4782 = vmatpush3.msra.mxu0 %v6023_v43 }
  0x1a   :  { %5366 = vmatprep.subr.msk.bf16.mxu0 %vm5959_vm4, %v7241_v32  ;;  %5342 = vmatprep.subr.bf16.mxu1 %v6059_v56 }
  0x1d   :  { %71 = vxpose.xlu0.b32.cont [5/7] (short) (narrow) %v5822_v55, 32 }
  0x21   :  { %72 = vxpose.xlu0.b32.cont [6/7] (short) (narrow) %v5824_v63, 32 }
  0x25   :  { %73 = vxpose.xlu0.b32.end [7/7] (short) (narrow) %v5826_v6, 32 }
  0x8d   :  { %v83_v15 = vpop.trf.xlu0 }
  0x8e   :  { %v101_v16 = vsel %vm99_vm11, %v83_v15, 0  ;;  %v939_v15 = vsub.f32 %v6136_v49, %v938_v60 }
  0x8f   :  { %v6084_v18 = vand.u32 4294901760, %v101_v16  ;;  %v796_v24 = vpop.trf.xlu1 }
  0x90   :  { %v814_v55 = vsel %vm812_vm14, %v796_v24, 0 }
  0x91   :  { %v6087_v19 = vsub.f32 %v101_v16, %v6084_v18  ;;  %v84_v20 = vpop.trf.xlu0  ;;  %v6170_v63 = vand.u32 4294901760, %v814_v55 }
  0x92   :  { %v104_v25 = vsel %vm99_vm11, %v84_v20, 0 }
  0x93   :  { %v6093_v26 = vand.u32 4294901760, %v6087_v19  ;;  %v6095_v27 = vand.u32 4294901760, %v104_v25  ;;  %4783 = vmatprep.mubr.f32.mxu0 %v6087_v19  ;;  %v797_v34 = vpop.trf.xlu1  ;;  %7261 = vst [vmem:[#allocation5_spill] sm:$0xff] %v6170_v63  ;;  %v6197_v16 = vsub.f32 %v814_v55, %v6170_v63 }
  0x94   :  { %v817_v2 = vsel %vm812_vm14, %v797_v34, 0 }
  0x95   :  { %v6104_v29 = vsub.f32 %v104_v25, %v6095_v27  ;;  %v85_v31 = vpop.trf.xlu0  ;;  %v191_v33 = vsub.f32 %v6087_v19, %v6093_v26  ;;  %7262 = vst [vmem:[#allocation6_spill] sm:$0xff] %v6197_v16  ;;  %v6199_v20 = vand.u32 4294901760, %v817_v2  ;;  %v6221_v42 = vand.u32 4294901760, %v6197_v16 }
  0x96   :  { %v107_v35 = vsel %vm99_vm11, %v85_v31, 0 }
  0x97   :  { %v6114_v38 = vand.u32 4294901760, %v6104_v29  ;;  %v6116_v39 = vand.u32 4294901760, %v107_v35  ;;  %4784 = vmatmul.mubr.f32.vlgmr.msra.gmra.mrb[0].mxu0 %v6104_v29  ;;  %v6119_v41 = vand.u32 4294901760, %v191_v33  ;;  %v798_v54 = vpop.trf.xlu1  ;;  %7263 = vst [vmem:[#allocation7_spill] sm:$0xff] %v6199_v20  ;;  %v940_v33 = vand.u32 4294901760, %v939_v15  ;;  %7267 = vst [vmem:[#allocation11_spill] sm:$0xff] %v6221_v42 }
  0x98   :  { %5368 = vmatpush3.bf16.msk.msra.mxu0 %vm5959_vm4, %v7241_v32  ;;  %v820_v3 = vsel %vm812_vm14, %v798_v54, 0  ;;  %v898_v17 = vsub.f32 %v6197_v16, %v6221_v42  ;;  %v4326_v15 = vld [vmem:[%s7223_s0 + $0x3] ss:$0 sm:$0xff] }
  0x99   :  { %v6127_v44 = vsub.f32 %v107_v35, %v6116_v39  ;;  %4743 = vmatprep.mubr.f32.mxu1 %v6119_v41  ;;  %v86_v46 = vpop.trf.xlu0  ;;  %5370 = vmatprep.subr.msk.bf16.mxu0 %vm6011_vm9, %v7241_v32  ;;  %v201_v47 = vsub.f32 %v6104_v29, %v6114_v38  ;;  %v6204_v25 = vand.u32 4294901760, %v820_v3  ;;  %v6214_v35 = vsub.f32 %v817_v2, %v6199_v20 }
  0x9a   :  { %v110_v48 = vsel %vm99_vm11, %v86_v46, 0  ;;  %vm2103_vm0 = vcmp.eq.s32.totalorder %v5896_v4, %v4326_v15  ;;  %vm2104_vm1 = vcmp.eq.s32.totalorder %v5910_v8, %v4326_v15  ;;  %vm2105_vm2 = vcmp.eq.s32.totalorder %v5915_v9, %v4326_v15 }
  0x9b   :  { %v6141_v51 = vand.u32 4294901760, %v6127_v44  ;;  %v6143_v52 = vand.u32 4294901760, %v110_v48  ;;  %4786 = vmatprep.mubr.f32.mxu0 %v6127_v44  ;;  %v6146_v53 = vand.u32 4294901760, %v201_v47  ;;  %v799_v6 = vpop.trf.xlu1  ;;  %7264 = vst [vmem:[#allocation8_spill] sm:$0xff] %v6204_v25  ;;  %7265 = vst [vmem:[#allocation9_spill] sm:$0xff] %v6214_v35  ;;  %v6224_v46 = vsub.f32 %v820_v3, %v6204_v25 }
  0x9c   :  { %5372 = vmatpush3.bf16.msk.msra.mxu0 %vm6011_vm9, %v7241_v32  ;;  %v7227_v47 = vmov 1.0   ;;  %v6243_v54 = vand.u32 4294901760, %v6214_v35  ;;  %v4327_v23 = vsel %vm2103_vm0, 1.0, %v7231_v10  ;;  %vm2106_vm3 = vcmp.eq.s32.totalorder %v5922_v12, %v4326_v15 }
  0x9d   :  { %v6156_v58 = vsub.f32 %v110_v48, %v6143_v52  ;;  %4744 = vmatmul.mubr.f32.vlgmr.msra.gmra.mrb[0].mxu1 %v6146_v53  ;;  %5374 = vmatprep.subr.msk.bf16.mxu0 %vm6034_vm10, %v7241_v32  ;;  %v211_v59 = vsub.f32 %v6127_v44, %v6141_v51  ;;  %7268 = vst [vmem:[#allocation12_spill] sm:$0xff] %v6224_v46  ;;  %v6256_v55 = vand.u32 4294901760, %v6224_v46  ;;  %v4329_v40 = vsel %vm2105_vm2, 1.0, %v7231_v10  ;;  %vm6371_vm7 = vmpackc.low %vm2106_vm3, %vm2105_vm2 }
  0x9e   :  { %5344 = vmatpush3.bf16.msra.mxu1 %v6059_v56  ;;  %v274_v56 = vsub.f32 %v6023_v43, %v6153_v57  ;;  %v946_v43 = vsub.f32 %v6138_v50, %v945_v61  ;;  %v6229_v48 = vpack.c.bf16 %v6101_v28, %v7227_v47  ;;  %7271 = vst [vmem:[#allocation13_spill] sm:$0xff] %v6243_v54 }
  0x9f   :  { %v6168_v62 = vand.u32 4294901760, %v6156_v58  ;;  %4787 = vmatmul.mubr.f32.gmra.mrb[2].mxu0 %v6156_v58  ;;  %5346 = vmatprep.subr.bf16.mxu1 %v6066_v0  ;;  %v6174_v1 = vand.u32 4294901760, %v211_v59  ;;  %7273 = vst [vmem:[#allocation15_spill] sm:$0xff] %v6256_v55  ;;  %v6266_v59 = vand.u32 4294901760, %v898_v17  ;;  %vm2107_vm5 = vcmp.eq.s32.totalorder %v5951_v21, %v4326_v15 }
  0xa0   :  { %5376 = vmatpush3.bf16.msk.msra.mxu0 %vm6034_vm10, %v7241_v32  ;;  %4803 = vmatprep.mubr.f32.mxu0 %v6093_v26  ;;  %v275_v31 = vand.u32 4294901760, %v274_v56  ;;  %v947_v34 = vand.u32 4294901760, %v946_v43  ;;  %v918_v56 = vsub.f32 %v6224_v46, %v6256_v55  ;;  %v4328_v43 = vsel %vm2104_vm1, 1.0, %v7231_v10 }
  0xa1   :  { %4746 = vmatprep.mubr.f32.mxu1 %v6174_v1  ;;  %4801 = vmatprep.subr.msk.mxu0 %vm112_vm8, %v6000_v37  ;;  %v221_v5 = vsub.f32 %v6156_v58, %v6168_v62  ;;  %vm2108_vm6 = vcmp.eq.s32.totalorder %v5954_v22, %v4326_v15  ;;  %v4331_v17 = vsel %vm2107_vm5, 1.0, %v7231_v10 }
  0xa2   :  { %5348 = vmatpush3.bf16.msra.mxu1 %v6066_v0  ;;  %v823_v0 = vsel %vm812_vm14, %v799_v6, 0  ;;  %v5411_v6 = vpack.c.bf16 %v6138_v50, %v6136_v49 }
  0xa3   :  { %5350 = vmatprep.subr.bf16.mxu1 %v6070_v7  ;;  %v6202_v24 = vand.u32 4294901760, %v221_v5  ;;  %v6218_v36 = vand.u32 4294901760, %v823_v0  ;;  %v6285_v5 = vand.u32 4294901760, %v918_v56 }
  0xa4   :  { %4802 = vmatpush3.msk.msra.mxu0 %vm112_vm8, %v6000_v37 }
  0xa5   :  { %4804 = vmatmul.mubr.f32.vlgmr.msra.gmra.mrb[0].mxu0 %v6114_v38  ;;  %5378 = vmatprep.subr.bf16.mxu0 %v6072_v11  ;;  %7266 = vst [vmem:[#allocation10_spill] sm:$0xff] %v6218_v36  ;;  %v6246_v28 = vsub.f32 %v823_v0, %v6218_v36  ;;  %7275 = vst [vmem:[#allocation17_spill] sm:$0xff] %v6285_v5  ;;  %v4330_v0 = vsel %vm2106_vm3, 1.0, %v7231_v10 }
  0xa6   :  { %4747 = vmatmul.mubr.f32.gmra.mrb[2].mxu1 %v6202_v24  ;;  %4806 = vmatprep.mubr.f32.mxu0 %v6141_v51  ;;  %v6353_v45 = vsub.f32 %v4330_v0, %v4330_v0 }
  0xa7   :  { %5352 = vmatpush3.bf16.msra.mxu1 %v6070_v7  ;;  %5380 = vmatpush3.bf16.msra.mxu0 %v6072_v11  ;;  %v5407_v11 = vpack.c.bf16 %v947_v34, %v940_v33  ;;  %7272 = vst [vmem:[#allocation14_spill] sm:$0xff] %v6246_v28  ;;  %v6269_v2 = vand.u32 4294901760, %v6246_v28  ;;  %v6336_v33 = vsub.f32 %v4328_v43, %v4328_v43 }
  0xa8   :  { %4763 = vmatprep.mubr.f32.mxu1 %v6084_v18  ;;  %4761 = vmatprep.subr.mxu1 %v275_v31  ;;  %v6340_v34 = vsub.f32 %v4329_v40, %v4329_v40  ;;  %v6390_v43 = vsub.f32 %v4331_v17, %v4331_v17  ;;  %v7233_v0 = vand.u32 4294901760, %v6353_v45 }
  0xa9   :  { %4807 = vmatmul.mubr.f32.gmra.mrb[2].mxu0 %v6168_v62  ;;  %5382 = vmatprep.subr.bf16.mxu0 %v6074_v13  ;;  %7274 = vst [vmem:[#allocation16_spill] sm:$0xff] %v6269_v2 }
  0xaa   :  { %4823 = vmatprep.mubr.f32.mxu0 %v6084_v18  ;;  %v2264_v17 = vsub.f32 %v6353_v45, %v7233_v0 }
  0xab   :  { %4762 = vmatpush3.msra.mxu1 %v275_v31  ;;  %5384 = vmatpush3.bf16.msra.mxu0 %v6074_v13  ;;  %v908_v13 = vsub.f32 %v6214_v35, %v6243_v54  ;;  %v6334_v31 = vsub.f32 %v4327_v23, %v4327_v23  ;;  %v7228_v23 = vand.u32 4294901760, %v6340_v34 }
  0xac   :  { %4764 = vmatmul.mubr.f32.vlgmr.msra.gmra.mrb[0].mxu1 %v6095_v27  ;;  %5403 = vmatprep.subr.msk.bf16.mxu1 %vm6237_vm15, %v6229_v48  ;;  %v2265_v0 = vand.u32 4294901760, %v2264_v17 }
  0xad   :  { %4766 = vmatprep.mubr.f32.mxu1 %v6116_v39  ;;  %5406 = vmatpush3.bf16.msk.msra.mxu1 %vm6237_vm15, %v6229_v48  ;;  %v6276_v3 = vand.u32 4294901760, %v908_v13  ;;  %v4332_v13 = vsel %vm2108_vm6, 1.0, %v7231_v10 }
  0xae   :  { %5386 = vmatprep.subr.bf16.mxu0 %v6076_v14  ;;  %5408 = vmatprep.subr.bf16.mxu1 %v5407_v11  ;;  %v6392_v40 = vsub.f32 %v4332_v13, %v4332_v13  ;;  %v7237_v13 = vand.u32 4294901760, %v6390_v43 }
  0xaf   :  { %5388 = vmatpush3.bf16.msra.mxu0 %v6076_v14  ;;  %v928_v14 = vsub.f32 %v6246_v28, %v6269_v2 }
  0xb0   :  { %4767 = vmatmul.mubr.f32.gmra.mrb[2].mxu1 %v6143_v52  ;;  %4821 = vmatprep.subr.mxu0 %v6153_v57  ;;  %v2271_v47 = vsub.f32 %v6390_v43, %v7237_v13  ;;  %v5527_v13 = vpack.c.bf16 %v6336_v33, %v6334_v31 }
  0xb1   :  { %4853 = vmatprep.mubr.f32.mxu1 %v6266_v59 }
  0xb3   :  { %4822 = vmatpush3.msra.mxu0 %v6153_v57  ;;  %v6298_v57 = vand.u32 4294901760, %v928_v14  ;;  %v7230_v14 = vand.u32 4294901760, %v6334_v31 }
  0xb4   :  { %4824 = vmatmul.mubr.f32.vlgmr.msra.gmra.mrb[0].mxu0 %v6095_v27  ;;  %5390 = vmatprep.subr.msk.bf16.mxu0 %vm5959_vm4, %v7241_v32 }
  0xb5   :  { %4854 = vmatmul.mubr.f32.vlgmr.msra.gmra.mrb[4].mxu1 %v6276_v3  ;;  %4826 = vmatprep.mubr.f32.mxu0 %v6116_v39  ;;  %7276 = vst [vmem:[#allocation18_spill] sm:$0xff] %v6298_v57  ;;  %v2243_v50 = vsub.f32 %v6334_v31, %v7230_v14 }
  0xb6   :  { %5392 = vmatpush3.bf16.msk.msra.mxu0 %vm5959_vm4, %v7241_v32  ;;  %4856 = vmatprep.mubr.f32.mxu1 %v6285_v5  ;;  %vm6346_vm4 = vmpackc.low %vm2104_vm1, %vm2103_vm0 }
  0xb7   :  { %5410 = vmatpush3.bf16.msra.mxu1 %v5407_v11  ;;  %5394 = vmatprep.subr.msk.bf16.mxu0 %vm6011_vm9, %v7241_v32 }
  0xb8   :  { %4827 = vmatmul.mubr.f32.gmra.mrb[2].mxu0 %v6143_v52  ;;  %5412 = vmatprep.subr.bf16.mxu1 %v5411_v6 }
  0xb9   :  { %4857 = vmatmul.mubr.f32.gmra.mrb[6].mxu1 %v6298_v57  ;;  %4843 = vmatprep.mubr.f32.mxu0 %v6084_v18 }
  0xba   :  { %5396 = vmatpush3.bf16.msk.msra.mxu0 %vm6011_vm9, %v7241_v32  ;;  %4863 = vmatprep.mubr.f32.mxu1 %v6170_v63  ;;  %vm2109_vm9 = vcmp.eq.s32.totalorder %v5983_v30, %v4326_v15 }
  0xbb   :  { %5398 = vmatprep.subr.msk.bf16.mxu0 %vm6034_vm10, %v7241_v32  ;;  %v6427_v15 = vsel %vm2109_vm9, 1.0, %v7231_v10 }
  0xbd   :  { %4864 = vmatmul.mubr.f32.vlgmr.msra.gmra.mrb[4].mxu1 %v6199_v20 }
  0xbe   :  { %5400 = vmatpush3.bf16.msk.msra.mxu0 %vm6034_vm10, %v7241_v32  ;;  %4866 = vmatprep.mubr.f32.mxu1 %v6204_v25  ;;  %vm6408_vm10 = vmpackc.low %vm2108_vm6, %vm2107_vm5 }
  0xbf   :  { %5414 = vmatpush3.bf16.msra.mxu1 %v5411_v6  ;;  %4841 = vmatprep.subr.msk.mxu0 %vm112_vm8, %v6000_v37  ;;  %v7229_v6 = vand.u32 4294901760, %v6336_v33 }
  0xc0   :  { %5417 = vmatprep.subr.msk.bf16.mxu1 %vm6237_vm15, %v6229_v48 }
  0xc1   :  { %4867 = vmatmul.mubr.f32.gmra.mrb[6].mxu1 %v6218_v36 }
  0xc2   :  { %4842 = vmatpush3.msk.msra.mxu0 %vm112_vm8, %v6000_v37  ;;  %4873 = vmatprep.mubr.f32.mxu1 %v6197_v16  ;;  %v5421_v37 = vpack.c.bf16 %v945_v61, %v938_v60  ;;  %v2250_v60 = vsub.f32 %v6336_v33, %v7229_v6  ;;  %v2257_v61 = vsub.f32 %v6340_v34, %v7228_v23  ;;  %v2125_v23 = vsel %vm112_vm8, %v6427_v15, 0 }
  0xc3   :  { %4844 = vmatmul.mubr.f32.vlgmr.msra.gmra.mrb[0].mxu0 %v6095_v27  ;;  %5504 = vmatprep.subr.msk.bf16.mxu0 %vm6346_vm4, %v7241_v32  ;;  %v2244_v6 = vand.u32 4294901760, %v2243_v50 }
  0xc4   :  { %4846 = vmatprep.mubr.f32.mxu0 %v6116_v39  ;;  %5506 = vmatpush3.bf16.msk.msra.mxu0 %vm6346_vm4, %v7241_v32  ;;  %v2251_v14 = vand.u32 4294901760, %v2250_v60  ;;  %v2258_v10 = vand.u32 4294901760, %v2257_v61  ;;  %v6462_v60 = vld [vmem:[%s7223_s0 + $0x2] ss:$0 sm:$0xff] }
  0xc5   :  { %4874 = vmatmul.mubr.f32.vlgmr.msra.gmra.mrb[4].mxu1 %v6214_v35  ;;  %5508 = vmatprep.subr.msk.bf16.mxu0 %vm6371_vm7, %v7241_v32  ;;  %v6450_v35 = vsub.f32 %v2125_v23, %v2125_v23  ;;  %v2272_v23 = vand.u32 4294901760, %v2271_v47  ;;  %vm1421_vm11 = vcmp.eq.s32.totalorder %v5896_v4, %v6462_v60  ;;  %vm1422_vm12 = vcmp.eq.s32.totalorder %v5910_v8, %v6462_v60 }
  0xc6   :  { %4876 = vmatprep.mubr.f32.mxu1 %v6224_v46  ;;  %5420 = vmatpush3.bf16.msk.msra.mxu1 %vm6237_vm15, %v6229_v48  ;;  %v5515_v50 = vpack.c.bf16 %v2251_v14, %v2244_v6  ;;  %v7284_v47 = vmov 0.0   ;;  %vm6483_vm13 = vmpackc.low %vm1422_vm12, %vm1421_vm11  ;;  %vm1423_vm14 = vcmp.eq.s32.totalorder %v5915_v9, %v6462_v60  ;;  %vm1424_vm0 = vcmp.eq.s32.totalorder %v5922_v12, %v6462_v60 }
  0xc7   :  { %4847 = vmatmul.mubr.f32.gmra.mrb[2].mxu0 %v6143_v52  ;;  %5422 = vmatprep.subr.bf16.mxu1 %v5421_v37  ;;  %v6467_v17 = vand.u32 4294901760, %v6450_v35  ;;  %v4298_v14 = vsel %vm1421_vm11, 1.0, %v7284_v47  ;;  %v4299_v6 = vsel %vm1422_vm12, 1.0, %v7284_v47  ;;  %v4301_v7 = vsel %vm1424_vm0, 1.0, %v7284_v47  ;;  %vm6529_vm2 = vmpackc.low %vm1424_vm0, %vm1423_vm14 }
  0xc8   :  { %5510 = vmatpush3.bf16.msk.msra.mxu0 %vm6371_vm7, %v7241_v32  ;;  %5043 = vmatprep.mubr.f32.mxu0 %v6119_v41  ;;  %vm1426_vm1 = vcmp.eq.s32.totalorder %v5954_v22, %v6462_v60  ;;  %vm1427_vm3 = vcmp.eq.s32.totalorder %v5983_v30, %v6462_v60 }
  0xc9   :  { %4877 = vmatmul.mubr.f32.gmra.mrb[6].mxu1 %v6246_v28  ;;  %5512 = vmatprep.subr.msk.bf16.mxu0 %vm6408_vm10, %v7241_v32  ;;  %v7283_v28 = vand.u32 4294901760, %v6392_v40 }
  0xca   :  { %4883 = vmatprep.mubr.f32.mxu1 %v6221_v42  ;;  %v7295_v42 = vmov 1.0|1.0  }
  0xcb   :  { %v2278_v46 = vsub.f32 %v6392_v40, %v7283_v28  ;;  %v5519_v28 = vpack.c.bf16 %v2265_v0, %v2258_v10  ;;  %v4300_v0 = vsel %vm1423_vm14, 1.0, %v7284_v47 }
  0xcc   :  { %5514 = vmatpush3.bf16.msk.msra.mxu0 %vm6408_vm10, %v7241_v32 }
  0xcd   :  { %4884 = vmatmul.mubr.f32.vlgmr.msra.gmra.mrb[4].mxu1 %v6243_v54  ;;  %5041 = vmatprep.subr.msk.mxu0 %vm112_vm8, %v6427_v15  ;;  %v2279_v61 = vand.u32 4294901760, %v2278_v46  ;;  %v2285_v46 = vsub.f32 %v6450_v35, %v6467_v17 }
  0xce   :  { %4886 = vmatprep.mubr.f32.mxu1 %v6256_v55  ;;  %5424 = vmatpush3.bf16.msra.mxu1 %v5421_v37 }
  0xcf   :  { %5427 = vmatprep.subr.msk.bf16.mxu1 %vm6237_vm15, %v6229_v48  ;;  %v5523_v10 = vpack.c.bf16 %v2279_v61, %v2272_v23  ;;  %v6513_v23 = vsub.f32 %v4300_v0, %v4300_v0  ;;  %v6515_v61 = vsub.f32 %v4301_v7, %v4301_v7  ;;  %v5531_v7 = vpack.c.bf16 %v6353_v45, %v6340_v34 }
  0xd0   :  { %5042 = vmatpush3.msk.msra.mxu0 %vm112_vm8, %v6427_v15 }
  0xd1   :  { %4887 = vmatmul.mubr.f32.gmra.mrb[6].mxu1 %v6269_v2  ;;  %5044 = vmatmul.mubr.f32.vlgmr.msra.gmra.mrb[4].mxu0 %v6146_v53 }
  0xd2   :  { %5516 = vmatprep.subr.bf16.mxu0 %v5515_v50  ;;  %4893 = vmatprep.mubr.f32.mxu1 %v6170_v63 }
  0xd3   :  { %5046 = vmatprep.mubr.f32.mxu0 %v6174_v1  ;;  %5518 = vmatpush3.bf16.msra.mxu0 %v5515_v50  ;;  %v6509_v50 = vsub.f32 %v4299_v6, %v4299_v6 }
  0xd4   :  { %5520 = vmatprep.subr.bf16.mxu0 %v5519_v28 }
  0xd5   :  { %4894 = vmatmul.mubr.f32.vlgmr.msra.gmra.mrb[4].mxu1 %v6199_v20  ;;  %5047 = vmatmul.mubr.f32.gmra.mrb[6].mxu0 %v6202_v24 }
  0xd6   :  { %4896 = vmatprep.mubr.f32.mxu1 %v6204_v25  ;;  %5430 = vmatpush3.bf16.msk.msra.mxu1 %vm6237_vm15, %v6229_v48  ;;  %v6507_v48 = vsub.f32 %v4298_v14, %v4298_v14  ;;  %vm1425_vm15 = vcmp.eq.s32.totalorder %v5951_v21, %v6462_v60  ;;  %v4303_v14 = vsel %vm1426_vm1, 1.0, %v7284_v47 }
  0xd7   :  { %5522 = vmatpush3.bf16.msra.mxu0 %v5519_v28  ;;  %5063 = vmatprep.mubr.f32.mxu0 %v6084_v18  ;;  %v2286_v28 = vand.u32 4294901760, %v2285_v46  ;;  %v6557_v6 = vsub.f32 %v4303_v14, %v4303_v14  ;;  %vm6575_vm5 = vmpackc.low %vm1426_vm1, %vm1425_vm15  ;;  %v6583_v14 = vsel %vm1427_vm3, 1.0, %v7284_v47 }
  0xd8   :  { %5524 = vmatprep.subr.bf16.mxu0 %v5523_v10  ;;  %5432 = vmatprep.subr.msk.bf16.mxu1 %vm6483_vm13, %v7241_v32  ;;  %v7289_v54 = vand.u32 4294901760, %v6507_v48  ;;  %v7304_v56 = vand.u32 4294901760, %v6507_v48 }
  0xd9   :  { %4897 = vmatmul.mubr.f32.gmra.mrb[6].mxu1 %v6218_v36  ;;  %v7297_v5 = vand.u32 4294901760, %v6557_v6 }
  0xda   :  { %4903 = vmatprep.mubr.f32.mxu1 %v6170_v63  ;;  %v1561_v2 = vsub.f32 %v6507_v48, %v7289_v54  ;;  %v5535_v54 = vpack.c.bf16 %v6392_v40, %v6390_v43 }
  0xdb   :  { %5526 = vmatpush3.bf16.msra.mxu0 %v5523_v10  ;;  %v4302_v10 = vsel %vm1425_vm15, 1.0, %v7284_v47 }
  0xdc   :  { %5061 = vmatprep.subr.mxu0 %v2286_v28  ;;  %v6555_v0 = vsub.f32 %v4302_v10, %v4302_v10 }
  0xdd   :  { %4904 = vmatmul.mubr.f32.vlgmr.msra.gmra.mrb[4].mxu1 %v6199_v20 }
  0xde   :  { %5434 = vmatpush3.bf16.msk.msra.mxu1 %vm6483_vm13, %v7241_v32  ;;  %4906 = vmatprep.mubr.f32.mxu1 %v6204_v25  ;;  %v1443_v25 = vsel %vm112_vm8, %v6583_v14, 0 }
  0xdf   :  { %5062 = vmatpush3.msra.mxu0 %v2286_v28  ;;  %5436 = vmatprep.subr.msk.bf16.mxu1 %vm6529_vm2, %v7241_v32  ;;  %v7290_v28 = vand.u32 4294901760, %v6509_v50  ;;  %v7294_v32 = vand.u32 4294901760, %v6515_v61  ;;  %v6604_v16 = vsub.f32 %v1443_v25, %v1443_v25 }
  0xe0   :  { %5064 = vmatmul.mubr.f32.vlgmr.msra.gmra.mrb[4].mxu0 %v6095_v27  ;;  %5528 = vmatprep.subr.bf16.mxu0 %v5527_v13 }
  0xe1   :  { %v1568_v55 = vsub.f32 %v6509_v50, %v7290_v28  ;;  %5066 = vmatprep.mubr.f32.mxu0 %v6116_v39  ;;  %5530 = vmatpush3.bf16.msra.mxu0 %v5527_v13  ;;  %v7293_v13 = vand.u32 4294901760, %v6513_v23  ;;  %v1582_v60 = vsub.f32 %v6515_v61, %v7294_v32  ;;  %v1562_v32 = vand.u32 4294901760, %v1561_v2 }
  0xe2   :  { %4907 = vmatmul.mubr.f32.gmra.mrb[6].mxu1 %v6218_v36  ;;  %5532 = vmatprep.subr.bf16.mxu0 %v5531_v7  ;;  %v7296_v36 = vand.u32 4294901760, %v6555_v0 }
  0xe3   :  { %v1575_v28 = vsub.f32 %v6513_v23, %v7293_v13  ;;  %5438 = vmatpush3.bf16.msk.msra.mxu1 %vm6529_vm2, %v7295_v42  ;;  %4923 = vmatprep.mubr.f32.mxu1 %v6119_v41  ;;  %v1569_v13 = vand.u32 4294901760, %v1568_v55  ;;  %v1583_v63 = vand.u32 4294901760, %v1582_v60  ;;  %v1596_v55 = vsub.f32 %v6557_v6, %v7297_v5 }
  0xe4   :  { %5067 = vmatmul.mubr.f32.gmra.mrb[6].mxu0 %v6143_v52  ;;  %5440 = vmatprep.subr.msk.bf16.mxu1 %vm6575_vm5, %v7295_v42  ;;  %v1589_v57 = vsub.f32 %v6555_v0, %v7296_v36  ;;  %v5455_v5 = vpack.c.bf16 %v6509_v50, %v6507_v48  ;;  %v7299_v60 = vand.u32 4294901760, %v6336_v33  ;;  %v7302_v33 = vand.u32 4294901760, %v6390_v43 }
  0xe5   :  { %5534 = vmatpush3.bf16.msra.mxu0 %v5531_v7  ;;  %5083 = vmatprep.mubr.f32.mxu0 %v6087_v19  ;;  %v1576_v20 = vand.u32 4294901760, %v1575_v28  ;;  %v5443_v2 = vpack.c.bf16 %v1569_v13, %v1562_v32  ;;  %v6619_v7 = vand.u32 4294901760, %v6604_v16  ;;  %v1597_v36 = vand.u32 4294901760, %v1596_v55 }
  0xe6   :  { %5536 = vmatprep.subr.bf16.mxu0 %v5535_v54  ;;  %v1590_v28 = vand.u32 4294901760, %v1589_v57  ;;  %v5459_v57 = vpack.c.bf16 %v6515_v61, %v6513_v23  ;;  %v7300_v13 = vand.u32 4294901760, %v6340_v34  ;;  %v7301_v55 = vand.u32 4294901760, %v6353_v45 }
  0xe7   :  { %5442 = vmatpush3.bf16.msk.msra.mxu1 %vm6575_vm5, %v7295_v42  ;;  %v5447_v25 = vpack.c.bf16 %v1583_v63, %v1576_v20  ;;  %v1603_v63 = vsub.f32 %v6604_v16, %v6619_v7  ;;  %v7303_v34 = vand.u32 4294901760, %v6392_v40  ;;  %v7305_v43 = vand.u32 4294901760, %v6509_v50 }
  0xe8   :  { %4921 = vmatprep.subr.msk.mxu1 %vm112_vm8, %v6583_v14  ;;  %v5451_v20 = vpack.c.bf16 %v1597_v36, %v1590_v28  ;;  %v7307_v28 = vand.u32 4294901760, %v6515_v61  ;;  %v6779_v61 = vld [vmem:[%s7223_s0 + $0x4] ss:$0 sm:$0xff] }
  0xe9   :  { %5538 = vmatpush3.bf16.msra.mxu0 %v5535_v54  ;;  %v7298_v54 = vand.u32 4294901760, %v6334_v31  ;;  %v5463_v31 = vpack.c.bf16 %v6557_v6, %v6555_v0  ;;  %v5559_v45 = vpack.c.bf16 %v7303_v34, %v7302_v33  ;;  %v5479_v40 = vpack.c.bf16 %v7305_v43, %v7304_v56 }
  0xea   :  { %5081 = vmatprep.subr.mxu0 %v6450_v35  ;;  %vm2786_vm14 = vcmp.eq.s32.totalorder %v5910_v8, %v6779_v61  ;;  %vm2785_vm15 = vcmp.eq.s32.totalorder %v5896_v4, %v6779_v61 }
  0xeb   :  { %4922 = vmatpush3.msk.msra.mxu1 %vm112_vm8, %v6583_v14  ;;  %v5551_v32 = vpack.c.bf16 %v7299_v60, %v7298_v54  ;;  %v4356_v34 = vsel %vm2785_vm15, 1.0, %v7284_v47 }
  0xec   :  { %4924 = vmatmul.mubr.f32.vlgmr.msra.gmra.mrb[8].mxu1 %v6146_v53  ;;  %5444 = vmatprep.subr.bf16.mxu1 %v5443_v2  ;;  %v6898_v43 = vsub.f32 %v4356_v34, %v4356_v34 }
  0xed   :  { %4926 = vmatprep.mubr.f32.mxu1 %v6174_v1  ;;  %5446 = vmatpush3.bf16.msra.mxu1 %v5443_v2  ;;  %v5555_v2 = vpack.c.bf16 %v7301_v55, %v7300_v13 }
  0xee   :  { %5082 = vmatpush3.msra.mxu0 %v6450_v35  ;;  %5448 = vmatprep.subr.bf16.mxu1 %v5447_v25  ;;  %v1604_v35 = vand.u32 4294901760, %v1603_v63 }
  0xef   :  { %5084 = vmatmul.mubr.f32.vlgmr.msra.gmra.mrb[4].mxu0 %v6104_v29  ;;  %5540 = vmatprep.subr.msk.bf16.mxu0 %vm6346_vm4, %v7295_v42 }
  0xf0   :  { %4927 = vmatmul.mubr.f32.gmra.mrb[10].mxu1 %v6202_v24  ;;  %5086 = vmatprep.mubr.f32.mxu0 %v6127_v44 }
  0xf1   :  { %5542 = vmatpush3.bf16.msk.msra.mxu0 %vm6346_vm4, %v7295_v42  ;;  %5450 = vmatpush3.bf16.msra.mxu1 %v5447_v25  ;;  %v7306_v25 = vand.u32 4294901760, %v6513_v23 }
  0xf2   :  { %4943 = vmatprep.mubr.f32.mxu1 %v6084_v18  ;;  %5544 = vmatprep.subr.msk.bf16.mxu0 %vm6371_vm7, %v7295_v42 }
  0xf3   :  { %5087 = vmatmul.mubr.f32.gmra.mrb[6].mxu0 %v6156_v58  ;;  %5452 = vmatprep.subr.bf16.mxu1 %v5451_v20  ;;  %v5483_v36 = vpack.c.bf16 %v7307_v28, %v7306_v25 }
  0xf4   :  { %5103 = vmatprep.mubr.f32.mxu0 %v6093_v26 }
  0xf5   :  { %5546 = vmatpush3.bf16.msk.msra.mxu0 %vm6371_vm7, %v7295_v42  ;;  %5454 = vmatpush3.bf16.msra.mxu1 %v5451_v20 }
  0xf6   :  { %5548 = vmatprep.subr.msk.bf16.mxu0 %vm6408_vm10, %v7295_v42  ;;  %4941 = vmatprep.subr.mxu1 %v1604_v35 }
  0xf9   :  { %5550 = vmatpush3.bf16.msk.msra.mxu0 %vm6408_vm10, %v7295_v42  ;;  %4942 = vmatpush3.msra.mxu1 %v1604_v35 }
  0xfa   :  { %4944 = vmatmul.mubr.f32.vlgmr.msra.gmra.mrb[8].mxu1 %v6095_v27  ;;  %5456 = vmatprep.subr.bf16.mxu1 %v5455_v5 }
  0xfb   :  { %4946 = vmatprep.mubr.f32.mxu1 %v6116_v39  ;;  %5458 = vmatpush3.bf16.msra.mxu1 %v5455_v5 }
  0xfc   :  { %5101 = vmatprep.subr.msk.mxu0 %vm112_vm8, %v6427_v15  ;;  %5460 = vmatprep.subr.bf16.mxu1 %v5459_v57 }
  0xfd   :  { %5102 = vmatpush3.msk.msra.mxu0 %vm112_vm8, %v6427_v15 }
  0xfe   :  { %5104 = vmatmul.mubr.f32.vlgmr.msra.gmra.mrb[4].mxu0 %v6114_v38  ;;  %5552 = vmatprep.subr.bf16.mxu0 %v5551_v32 }
  0xff   :  { %4947 = vmatmul.mubr.f32.gmra.mrb[10].mxu1 %v6143_v52  ;;  %5106 = vmatprep.mubr.f32.mxu0 %v6141_v51 }
 0x100   :  { %5554 = vmatpush3.bf16.msra.mxu0 %v5551_v32  ;;  %5462 = vmatpush3.bf16.msra.mxu1 %v5459_v57  ;;  %v7312_v32 = vand.u32 4294901760, %v6555_v0 }
 0x101   :  { %4963 = vmatprep.mubr.f32.mxu1 %v6087_v19  ;;  %5556 = vmatprep.subr.bf16.mxu0 %v5555_v2 }
 0x102   :  { %5107 = vmatmul.mubr.f32.gmra.mrb[6].mxu0 %v6168_v62  ;;  %5464 = vmatprep.subr.bf16.mxu1 %v5463_v31 }
 0x103   :  { %5123 = vmatprep.mubr.f32.mxu0 %v6084_v18 }
 0x104   :  { %5558 = vmatpush3.bf16.msra.mxu0 %v5555_v2  ;;  %5466 = vmatpush3.bf16.msra.mxu1 %v5463_v31 }
 0x105   :  { %5560 = vmatprep.subr.bf16.mxu0 %v5559_v45  ;;  %4961 = vmatprep.subr.mxu1 %v6604_v16 }
 0x108   :  { %5562 = vmatpush3.bf16.msra.mxu0 %v5559_v45  ;;  %4962 = vmatpush3.msra.mxu1 %v6604_v16  ;;  %v6712_v16 = vld [vmem:[%s7223_s0 + $0x5] ss:$0 sm:$0xff]  ;;  %s5866_s0 = smov [#allocation2]  }
 0x109   :  { %4964 = vmatmul.mubr.f32.vlgmr.msra.gmra.mrb[8].mxu1 %v6104_v29  ;;  %5468 = vmatprep.subr.msk.bf16.mxu1 %vm6483_vm13, %v7295_v42  ;;  %vm3388_vm6 = vcmp.eq.s32.totalorder %v5910_v8, %v6712_v16  ;;  %vm3390_vm9 = vcmp.eq.s32.totalorder %v5922_v12, %v6712_v16  ;;  %vm3391_vm11 = vcmp.eq.s32.totalorder %v5951_v21, %v6712_v16  ;;  %v7313_v8 = vand.u32 4294901760, %v6557_v6  ;;  %s4251_s13 = sshll.u32 %s5866_s0, 4  ;;  %s4252_s13 = int_to_ptr.vmem [resolvable:$true] %s4251_s13 }
 0x10a   :  { %4966 = vmatprep.mubr.f32.mxu1 %v6127_v44  ;;  %5470 = vmatpush3.bf16.msk.msra.mxu1 %vm6483_vm13, %v7295_v42  ;;  %v4368_v63 = vsel %vm3390_vm9, 1.0, %v7284_v47  ;;  %vm3392_vm12 = vcmp.eq.s32.totalorder %v5954_v22, %v6712_v16  ;;  %v4369_v54 = vsel %vm3391_vm11, 1.0, %v7284_v47  ;;  %v6848_v6 = vsel %vm2786_vm14, 1.0, %v7284_v47  ;;  %s5839_s14 = scalar_lea.vmem %s4252_s13, 32  ;;  %p5844_p1 = scmp.lt.s32.totalorder %s4252_s13, %s4252_s13 }
 0x10b   :  { %5121 = vmatprep.subr.mxu0 %v6467_v17  ;;  %5472 = vmatprep.subr.msk.bf16.mxu1 %vm6529_vm2, %v7295_v42  ;;  %v6794_v35 = vsub.f32 %v4368_v63, %v4368_v63  ;;  %v4370_v60 = vsel %vm3392_vm12, 1.0, %v7284_v47  ;;  %v5487_v13 = vpack.c.bf16 %v7313_v8, %v7312_v32  ;;  %v6841_v12 = vsub.f32 %v4369_v54, %v4369_v54  ;;  %vm6867_vm1 = vmpackc.low %vm3392_vm12, %vm3391_vm11  ;;  %p5840_p0 = scmp.ne.s32.totalorder %s4252_s13, %s5839_s14  ;;  %p5845_p2 = scmp.lt.s32.totalorder %s5839_s14, %s5839_s14 }
 0x10c   :  { %5122 = vmatpush3.msra.mxu0 %v6467_v17  ;;  %v4366_v17 = vsel %vm3388_vm6, 1.0, %v7284_v47  ;;  %v6843_v2 = vsub.f32 %v4370_v60, %v4370_v60  ;;  %vm3393_vm3 = vcmp.eq.s32.totalorder %v5983_v30, %v6712_v16  ;;  %v2792_v21 = vsel %vm112_vm8, %v6848_v6, 0 }
 0x10d   :  { %5124 = vmatmul.mubr.f32.vlgmr.msra.gmra.mrb[4].mxu0 %v6095_v27  ;;  %5564 = vmatprep.subr.msk.bf16.mxu0 %vm6346_vm4, %v7295_v42  ;;  %v6773_v23 = vsub.f32 %v4366_v17, %v4366_v17  ;;  %v6896_v56 = vsel %vm3393_vm3, 1.0, %v7284_v47  ;;  %v2904_v63 = vand.u32 4294901760, %v6898_v43  ;;  %p5846_p3 = por %p5845_p2, %p5844_p1 }
 0x10e   :  { %4967 = vmatmul.mubr.f32.gmra.mrb[10].mxu1 %v6156_v58  ;;  %5126 = vmatprep.mubr.f32.mxu0 %v6116_v39  ;;  %v3561_v45 = vand.u32 4294901760, %v6843_v2  ;;  %v3409_v17 = vsel %vm112_vm8, %v6896_v56, 0 }
 0x10f   :  { %5566 = vmatpush3.bf16.msk.msra.mxu0 %vm6346_vm4, %v7295_v42  ;;  %5474 = vmatpush3.bf16.msk.msra.mxu1 %vm6529_vm2, %v7295_v42  ;;  %vm3387_vm4 = vcmp.eq.s32.totalorder %v5896_v4, %v6712_v16  ;;  %v3533_v57 = vand.u32 4294901760, %v6773_v23  ;;  %p5847_p4 = pnand %p5846_p3, %p5840_p0 }
 0x110   :  { %4983 = vmatprep.mubr.f32.mxu1 %v6093_v26  ;;  %5568 = vmatprep.subr.msk.bf16.mxu0 %vm6371_vm7, %v7295_v42  ;;  %v4365_v11 = vsel %vm3387_vm4, 1.0, %v7284_v47 }
 0x111   :  { %5127 = vmatmul.mubr.f32.gmra.mrb[6].mxu0 %v6143_v52  ;;  %5476 = vmatprep.subr.msk.bf16.mxu1 %vm6575_vm5, %v7295_v42  ;;  %v6758_v48 = vsub.f32 %v4365_v11, %v4365_v11  ;;  %v3534_v31 = vsub.f32 %v6773_v23, %v3533_v57 }
 0x112   :  { %5143 = vmatprep.mubr.f32.mxu0 %v6084_v18 }
 0x113   :  { %5570 = vmatpush3.bf16.msk.msra.mxu0 %vm6371_vm7, %v7295_v42  ;;  %5478 = vmatpush3.bf16.msk.msra.mxu1 %vm6575_vm5, %v7295_v42  ;;  %vm3389_vm7 = vcmp.eq.s32.totalorder %v5915_v9, %v6712_v16  ;;  %v3526_v5 = vand.u32 4294901760, %v6758_v48  ;;  %v3547_v9 = vand.u32 4294901760, %v6794_v35  ;;  %v3535_v11 = vand.u32 4294901760, %v3534_v31 }
 0x114   :  { %5572 = vmatprep.subr.msk.bf16.mxu0 %vm6408_vm10, %v7295_v42  ;;  %4981 = vmatprep.subr.msk.mxu1 %vm112_vm8, %v6583_v14  ;;  %v4367_v50 = vsel %vm3389_vm7, 1.0, %v7284_v47  ;;  %vm6826_vm0 = vmpackc.low %vm3390_vm9, %vm3389_vm7  ;;  %v5629_v4 = vpack.c.bf16 %v6773_v23, %v6758_v48 }
 0x115   :  { %v6792_v20 = vsub.f32 %v4367_v50, %v4367_v50  ;;  %v3527_v0 = vsub.f32 %v6758_v48, %v3526_v5  ;;  %v3548_v30 = vsub.f32 %v6794_v35, %v3547_v9  ;;  %v7331_v48 = vld [vmem:[#allocation15_spill] sm:$0xff] }
 0x117   :  { %5574 = vmatpush3.bf16.msk.msra.mxu0 %vm6408_vm10, %v7295_v42  ;;  %4982 = vmatpush3.msk.msra.mxu1 %vm112_vm8, %v6583_v14  ;;  %vm6788_vm10 = vmpackc.low %vm3388_vm6, %vm3387_vm4  ;;  %v3540_v55 = vand.u32 4294901760, %v6792_v20  ;;  %v3528_v16 = vand.u32 4294901760, %v3527_v0  ;;  %v3549_v28 = vand.u32 4294901760, %v3548_v30  ;;  %v5633_v10 = vpack.c.bf16 %v6794_v35, %v6792_v20 }
 0x118   :  { %4984 = vmatmul.mubr.f32.vlgmr.msra.gmra.mrb[8].mxu1 %v6114_v38  ;;  %5480 = vmatprep.subr.bf16.mxu1 %v5479_v40 }
 0x119   :  { %4986 = vmatprep.mubr.f32.mxu1 %v6141_v51  ;;  %5482 = vmatpush3.bf16.msra.mxu1 %v5479_v40  ;;  %v3541_v22 = vsub.f32 %v6792_v20, %v3540_v55  ;;  %v6900_v40 = vsub.f32 %v2792_v21, %v2792_v21  ;;  %v5617_v50 = vpack.c.bf16 %v3535_v11, %v3528_v16  ;;  %v7321_v16 = vld [vmem:[#allocation5_spill] sm:$0xff]  ;;  %v7322_v11 = vld [vmem:[#allocation7_spill] sm:$0xff] }
 0x11a   :  { %5141 = vmatprep.subr.msk.mxu0 %vm112_vm8, %v6427_v15  ;;  %5484 = vmatprep.subr.bf16.mxu1 %v5483_v36 }
 0x11b   :  { %5142 = vmatpush3.msk.msra.mxu0 %vm112_vm8, %v6427_v15  ;;  %v3542_v25 = vand.u32 4294901760, %v3541_v22  ;;  %v2911_v54 = vand.u32 4294901760, %v6900_v40  ;;  %v5585_v61 = vpack.c.bf16 %v6900_v40, %v6898_v43 }
 0x11c   :  { %5144 = vmatmul.mubr.f32.vlgmr.msra.gmra.mrb[4].mxu0 %v6095_v27  ;;  %5606 = vmatprep.subr.msk.bf16.mxu0 %vm6788_vm10, %v7295_v42 }
 0x11d   :  { %4987 = vmatmul.mubr.f32.gmra.mrb[10].mxu1 %v6168_v62  ;;  %5146 = vmatprep.mubr.f32.mxu0 %v6116_v39  ;;  %v5621_v60 = vpack.c.bf16 %v3549_v28, %v3542_v25  ;;  %v2912_v0 = vsub.f32 %v6900_v40, %v2911_v54  ;;  %v7327_v25 = vld [vmem:[#allocation12_spill] sm:$0xff]  ;;  %v7330_v40 = vld [vmem:[#allocation13_spill] sm:$0xff]  ;;  %v5657_v28 = vpack.c.bf16 %v3547_v9, %v3540_v55 }
 0x11e   :  { %5608 = vmatpush3.bf16.msk.msra.mxu0 %vm6788_vm10, %v7295_v42  ;;  %5486 = vmatpush3.bf16.msra.mxu1 %v5483_v36  ;;  %v3562_v36 = vsub.f32 %v6843_v2, %v3561_v45 }
 0x11f   :  { %5003 = vmatprep.mubr.f32.mxu1 %v6084_v18  ;;  %5610 = vmatprep.subr.msk.bf16.mxu0 %vm6826_vm0, %v7295_v42  ;;  %v2913_v34 = vand.u32 4294901760, %v2912_v0 }
 0x120   :  { %5147 = vmatmul.mubr.f32.gmra.mrb[6].mxu0 %v6143_v52  ;;  %5488 = vmatprep.subr.bf16.mxu1 %v5487_v13  ;;  %v3563_v37 = vand.u32 4294901760, %v3562_v36 }
 0x121   :  { %5223 = vmatprep.mubr.f32.mxu0 %v6119_v41  ;;  %v3554_v41 = vand.u32 4294901760, %v6841_v12 }
 0x122   :  { %5612 = vmatpush3.bf16.msk.msra.mxu0 %vm6826_vm0, %v7295_v42  ;;  %5490 = vmatpush3.bf16.msra.mxu1 %v5487_v13  ;;  %v2905_v13 = vsub.f32 %v6898_v43, %v2904_v63  ;;  %v5653_v43 = vpack.c.bf16 %v3533_v57, %v3526_v5  ;;  %v7332_v5 = vld [vmem:[#allocation16_spill] sm:$0xff] }
 0x123   :  { %5614 = vmatprep.subr.msk.bf16.mxu0 %vm6867_vm1, %v7295_v42  ;;  %5001 = vmatprep.subr.mxu1 %v6619_v7  ;;  %v3555_v47 = vsub.f32 %v6841_v12, %v3554_v41  ;;  %v5661_v23 = vpack.c.bf16 %v3561_v45, %v3554_v41 }
 0x124   :  { %v2906_v31 = vand.u32 4294901760, %v2905_v13 }
 0x125   :  { %v3556_v32 = vand.u32 4294901760, %v3555_v47 }
 0x126   :  { %5616 = vmatpush3.bf16.msk.msra.mxu0 %vm6867_vm1, %v7295_v42  ;;  %5002 = vmatpush3.msra.mxu1 %v6619_v7  ;;  %v6922_v7 = vsub.f32 %v3409_v17, %v3409_v17  ;;  %v5581_v30 = vpack.c.bf16 %v2913_v34, %v2906_v31  ;;  %v7325_v17 = vld [vmem:[#allocation6_spill] sm:$0xff] }
 0x127   :  { %5004 = vmatmul.mubr.f32.vlgmr.msra.gmra.mrb[8].mxu1 %v6095_v27  ;;  %5492 = vmatprep.subr.msk.bf16.mxu1 %vm6483_vm13, %v7295_v42 }
 0x128   :  { %5006 = vmatprep.mubr.f32.mxu1 %v6116_v39  ;;  %5494 = vmatpush3.bf16.msk.msra.mxu1 %vm6483_vm13, %v7295_v42  ;;  %v6937_v8 = vand.u32 4294901760, %v6922_v7  ;;  %vm6969_vm13 = vmpackc.low %vm112_vm8, %vm2785_vm15  ;;  %vm4242_vm15 = vcmask 1040384  }
 0x129   :  { %5221 = vmatprep.subr.msk.mxu0 %vm112_vm8, %v6896_v56  ;;  %5496 = vmatprep.subr.msk.bf16.mxu1 %vm6529_vm2, %v7295_v42 }
 0x12a   :  { %5222 = vmatpush3.msk.msra.mxu0 %vm112_vm8, %v6896_v56 }
 0x12b   :  { %5224 = vmatmul.mubr.f32.vlgmr.msra.gmra.mrb[8].mxu0 %v6146_v53  ;;  %5618 = vmatprep.subr.bf16.mxu0 %v5617_v50  ;;  %v5625_v53 = vpack.c.bf16 %v3563_v37, %v3556_v32 }
 0x12c   :  { %5007 = vmatmul.mubr.f32.gmra.mrb[10].mxu1 %v6143_v52  ;;  %5226 = vmatprep.mubr.f32.mxu0 %v6174_v1  ;;  %v3569_v1 = vsub.f32 %v6922_v7, %v6937_v8 }
 0x12d   :  { %5620 = vmatpush3.bf16.msra.mxu0 %v5617_v50  ;;  %5498 = vmatpush3.bf16.msk.msra.mxu1 %vm6529_vm2, %v7295_v42 }
 0x12e   :  { %5023 = vmatprep.mubr.f32.mxu1 %v6084_v18  ;;  %5622 = vmatprep.subr.bf16.mxu0 %v5621_v60  ;;  %v3570_v22 = vand.u32 4294901760, %v3569_v1 }
 0x12f   :  { %5227 = vmatmul.mubr.f32.gmra.mrb[10].mxu0 %v6202_v24  ;;  %5500 = vmatprep.subr.msk.bf16.mxu1 %vm6575_vm5, %v7295_v42  ;;  %v7316_v24 = vmov 1.0  }
 0x130   :  { %5243 = vmatprep.mubr.f32.mxu0 %v6084_v18  ;;  %v6963_v46 = vpack.c.bf16 %v6848_v6, %v7316_v24  ;;  %v7319_v6 = vld [vmem:[#allocation17_spill] sm:$0xff] }
 0x131   :  { %5624 = vmatpush3.bf16.msra.mxu0 %v5621_v60  ;;  %5502 = vmatpush3.bf16.msk.msra.mxu1 %vm6575_vm5, %v7295_v42 }
 0x132   :  { %5626 = vmatprep.subr.bf16.mxu0 %v5625_v53  ;;  %5021 = vmatprep.subr.msk.mxu1 %vm112_vm8, %v6583_v14 }
 0x135   :  { %5628 = vmatpush3.bf16.msra.mxu0 %v5625_v53  ;;  %5022 = vmatpush3.msk.msra.mxu1 %vm112_vm8, %v6583_v14  ;;  %v5637_v14 = vpack.c.bf16 %v6843_v2, %v6841_v12 }
 0x136   :  { %5024 = vmatmul.mubr.f32.vlgmr.msra.gmra.mrb[8].mxu1 %v6095_v27  ;;  %5577 = vmatprep.subr.msk.bf16.mxu1 %vm6969_vm13, %v6963_v46 }
 0x137   :  { %5026 = vmatprep.mubr.f32.mxu1 %v6116_v39  ;;  %5580 = vmatpush3.bf16.msk.msra.mxu1 %vm6969_vm13, %v6963_v46 }
 0x138   :  { %5241 = vmatprep.subr.mxu0 %v3570_v22  ;;  %5582 = vmatprep.subr.bf16.mxu1 %v5581_v30 }
 0x139   :  { %5242 = vmatpush3.msra.mxu0 %v3570_v22 }
 0x13a   :  { %5244 = vmatmul.mubr.f32.vlgmr.msra.gmra.mrb[8].mxu0 %v6095_v27  ;;  %5630 = vmatprep.subr.bf16.mxu0 %v5629_v4 }
 0x13b   :  { %5027 = vmatmul.mubr.f32.gmra.mrb[10].mxu1 %v6143_v52  ;;  %5246 = vmatprep.mubr.f32.mxu0 %v6116_v39 }
 0x13c   :  { %5632 = vmatpush3.bf16.msra.mxu0 %v5629_v4  ;;  %5153 = vmatprep.mubr.f32.mxu1 %v6266_v59  ;;  %v7320_v59 = vld [vmem:[#allocation18_spill] sm:$0xff] }
 0x13d   :  { %5634 = vmatprep.subr.bf16.mxu0 %v5633_v10 }
 0x13e   :  { %5247 = vmatmul.mubr.f32.gmra.mrb[10].mxu0 %v6143_v52 }
 0x13f   :  { %5154 = vmatmul.mubr.f32.vlgmr.msra.gmra.mrb[12].mxu1 %v6276_v3  ;;  %5263 = vmatprep.mubr.f32.mxu0 %v6087_v19  ;;  %v7323_v3 = vld [vmem:[#allocation8_spill] sm:$0xff]  ;;  %v7324_v19 = vld [vmem:[#allocation10_spill] sm:$0xff] }
 0x140   :  { %5636 = vmatpush3.bf16.msra.mxu0 %v5633_v10  ;;  %5156 = vmatprep.mubr.f32.mxu1 %v7319_v6 }
 0x141   :  { %5584 = vmatpush3.bf16.msra.mxu1 %v5581_v30  ;;  %5638 = vmatprep.subr.bf16.mxu0 %v5637_v14 }
 0x142   :  { %5586 = vmatprep.subr.bf16.mxu1 %v5585_v61 }
 0x143   :  { %5157 = vmatmul.mubr.f32.gmra.mrb[14].mxu1 %v7320_v59 }
 0x144   :  { %5640 = vmatpush3.bf16.msra.mxu0 %v5637_v14  ;;  %5163 = vmatprep.mubr.f32.mxu1 %v7321_v16 }
 0x145   :  { %5261 = vmatprep.subr.mxu0 %v6922_v7 }
 0x147   :  { %5164 = vmatmul.mubr.f32.vlgmr.msra.gmra.mrb[12].mxu1 %v7322_v11 }
 0x148   :  { %5262 = vmatpush3.msra.mxu0 %v6922_v7  ;;  %5166 = vmatprep.mubr.f32.mxu1 %v7323_v3 }
 0x149   :  { %5588 = vmatpush3.bf16.msra.mxu1 %v5585_v61  ;;  %5264 = vmatmul.mubr.f32.vlgmr.msra.gmra.mrb[8].mxu0 %v6104_v29  ;;  %v5595_v29 = vpack.c.bf16 %v2911_v54, %v2904_v63 }
 0x14a   :  { %5642 = vmatprep.subr.msk.bf16.mxu0 %vm6788_vm10, %v7295_v42  ;;  %5266 = vmatprep.mubr.f32.mxu0 %v6127_v44  ;;  %v7326_v44 = vld [vmem:[#allocation9_spill] sm:$0xff] }
 0x14b   :  { %5644 = vmatpush3.bf16.msk.msra.mxu0 %vm6788_vm10, %v7295_v42  ;;  %5167 = vmatmul.mubr.f32.gmra.mrb[14].mxu1 %v7324_v19 }
 0x14c   :  { %5173 = vmatprep.mubr.f32.mxu1 %v7325_v17  ;;  %5646 = vmatprep.subr.msk.bf16.mxu0 %vm6826_vm0, %v7295_v42 }
 0x14d   :  { %5267 = vmatmul.mubr.f32.gmra.mrb[10].mxu0 %v6156_v58  ;;  %5591 = vmatprep.subr.msk.bf16.mxu1 %vm6969_vm13, %v6963_v46  ;;  %v7329_v58 = vld [vmem:[#allocation11_spill] sm:$0xff] }
 0x14e   :  { %5283 = vmatprep.mubr.f32.mxu0 %v6093_v26  ;;  %v7328_v26 = vld [vmem:[#allocation14_spill] sm:$0xff] }
 0x14f   :  { %5648 = vmatpush3.bf16.msk.msra.mxu0 %vm6826_vm0, %v7295_v42  ;;  %5174 = vmatmul.mubr.f32.vlgmr.msra.gmra.mrb[12].mxu1 %v7326_v44 }
 0x150   :  { %5176 = vmatprep.mubr.f32.mxu1 %v7327_v25  ;;  %5594 = vmatpush3.bf16.msk.msra.mxu1 %vm6969_vm13, %v6963_v46 }
 0x151   :  { %5650 = vmatprep.subr.msk.bf16.mxu0 %vm6867_vm1, %v7295_v42  ;;  %5596 = vmatprep.subr.bf16.mxu1 %v5595_v29 }
 0x153   :  { %5652 = vmatpush3.bf16.msk.msra.mxu0 %vm6867_vm1, %v7295_v42  ;;  %5177 = vmatmul.mubr.f32.gmra.mrb[14].mxu1 %v7328_v26 }
 0x154   :  { %5183 = vmatprep.mubr.f32.mxu1 %v7329_v58  ;;  %5281 = vmatprep.subr.msk.mxu0 %vm112_vm8, %v6896_v56 }
 0x157   :  { %5282 = vmatpush3.msk.msra.mxu0 %vm112_vm8, %v6896_v56  ;;  %5184 = vmatmul.mubr.f32.vlgmr.msra.gmra.mrb[12].mxu1 %v7330_v40 }
 0x158   :  { %5284 = vmatmul.mubr.f32.vlgmr.msra.gmra.mrb[8].mxu0 %v6114_v38  ;;  %5654 = vmatprep.subr.bf16.mxu0 %v5653_v43 }
 0x159   :  { %5286 = vmatprep.mubr.f32.mxu0 %v6141_v51  ;;  %5656 = vmatpush3.bf16.msra.mxu0 %v5653_v43 }
 0x15a   :  { %5186 = vmatprep.mubr.f32.mxu1 %v7331_v48  ;;  %5598 = vmatpush3.bf16.msra.mxu1 %v5595_v29 }
 0x15b   :  { %5658 = vmatprep.subr.bf16.mxu0 %v5657_v28  ;;  %5187 = vmatmul.mubr.f32.gmra.mrb[14].mxu1 %v7332_v5 }
 0x15c   :  { %5287 = vmatmul.mubr.f32.gmra.mrb[10].mxu0 %v6168_v62  ;;  %5193 = vmatprep.mubr.f32.mxu1 %v7321_v16 }
 0x15d   :  { %5660 = vmatpush3.bf16.msra.mxu0 %v5657_v28  ;;  %5303 = vmatprep.mubr.f32.mxu0 %v6084_v18 }
 0x15e   :  { %5662 = vmatprep.subr.bf16.mxu0 %v5661_v23  ;;  %5601 = vmatprep.subr.msk.bf16.mxu1 %vm6969_vm13, %v6963_v46 }
 0x15f   :  { %5194 = vmatmul.mubr.f32.vlgmr.msra.gmra.mrb[12].mxu1 %v7322_v11 }
 0x160   :  { %5196 = vmatprep.mubr.f32.mxu1 %v7323_v3  ;;  %5604 = vmatpush3.bf16.msk.msra.mxu1 %vm6969_vm13, %v6963_v46 }
 0x161   :  { %5664 = vmatpush3.bf16.msra.mxu0 %v5661_v23  ;;  %5677 = vmatprep.subr.msk.bf16.mxu1 %vm6788_vm10, %v7295_v42 }
 0x162   :  { %5301 = vmatprep.subr.mxu0 %v6937_v8 }
 0x163   :  { %5197 = vmatmul.mubr.f32.gmra.mrb[14].mxu1 %v7324_v19 }
 0x164   :  { %5203 = vmatprep.mubr.f32.mxu1 %v7321_v16 }
 0x165   :  { %5302 = vmatpush3.msra.mxu0 %v6937_v8 }
 0x166   :  { %5304 = vmatmul.mubr.f32.vlgmr.msra.gmra.mrb[8].mxu0 %v6095_v27  ;;  %5666 = vmatprep.subr.msk.bf16.mxu0 %vm6788_vm10, %v7295_v42 }
 0x167   :  { %5306 = vmatprep.mubr.f32.mxu0 %v6116_v39  ;;  %5668 = vmatpush3.bf16.msk.msra.mxu0 %vm6788_vm10, %v7295_v42 }
 0x168   :  { %5204 = vmatmul.mubr.f32.vlgmr.msra.gmra.mrb[12].mxu1 %v7322_v11  ;;  %5670 = vmatprep.subr.msk.bf16.mxu0 %vm6826_vm0, %v7295_v42 }
 0x169   :  { %5681 = vmatpush3.bf16.msk.msra.mxu1 %vm6788_vm10, %v7295_v42  ;;  %5206 = vmatprep.mubr.f32.mxu1 %v7323_v3 }
 0x16a   :  { %5307 = vmatmul.mubr.f32.gmra.mrb[10].mxu0 %v6143_v52  ;;  %5678 = vmatprep.subr.msk.bf16.mxu1 %vm6826_vm0, %v7295_v42 }
 0x16b   :  { %5672 = vmatpush3.bf16.msk.msra.mxu0 %vm6826_vm0, %v7295_v42  ;;  %5323 = vmatprep.mubr.f32.mxu0 %v6084_v18 }
 0x16c   :  { %5207 = vmatmul.mubr.f32.gmra.mrb[14].mxu1 %v7324_v19  ;;  %5674 = vmatprep.subr.msk.bf16.mxu0 %vm6867_vm1, %v7295_v42 }
 0x16d   :  { %5682 = vmatpush3.bf16.msk.msra.mxu1 %vm6826_vm0, %v7295_v42  ;;  %5326 = vmatprep.mubr.f32.mxu1 %v6116_v39 }
 0x16e   :  { %5679 = vmatprep.subr.msk.bf16.mxu1 %vm6867_vm1, %v7295_v42 }
 0x16f   :  { %5676 = vmatpush3.bf16.msk.msra.mxu0 %vm6867_vm1, %v7295_v42 }
 0x170   :  { %5321 = vmatprep.subr.msk.mxu0 %vm112_vm8, %v6896_v56 }
 0x171   :  { %5683 = vmatpush3.bf16.msk.msra.mxu1 %vm6867_vm1, %v7295_v42 }
 0x172   :  { %5680 = vmatprep.subr.msk.mxu1 %vm112_vm8, %v6896_v56 }
 0x173   :  { %5322 = vmatpush3.msk.msra.mxu0 %vm112_vm8, %v6896_v56 }
 0x174   :  { %5324 = vmatmul.mubr.f32.vlgmr.msra.gmra.mrb[8].mxu0 %v6095_v27 }
 0x175   :  { %5684 = vmatpush3.msk.msra.mxu1 %vm112_vm8, %v6896_v56 }
 0x176   :  { %5327 = vmatmul.mubr.f32.vlgmr.msra.gmra.mrb[16].mxu1 %v6143_v52 }
 0x17f   :  { %v4765_v18 = vpop.f32.mrb[0].mxu1 }
 0x180   :  { %v330_v38 = vpop.f32.mrb[1].mxu1 }
 0x183   :  { %v4768_v39 = vpop.f32.mrb[2].mxu1 }
 0x184   :  { %v342_v51 = vpop.f32.mrb[3].mxu1 }
 0x196   :  { %v4845_v62 = vpop.f32.mrb[0].mxu0 }
 0x197   :  { %v7133_v49 = vadd.f32 %v4845_v62, %v4765_v18  ;;  %v747_v42 = vpop.f32.mrb[1].mxu0 }
 0x198   :  { %v7135_v20 = vadd.f32 %v747_v42, %v330_v38 }
 0x199   :  { %v4065_v35 = vmul.f32 %v7133_v49, %v7133_v49 }
 0x19a   :  { %v4064_v27 = vmul.f32 %v7135_v20, %v7135_v20  ;;  %v4848_v57 = vpop.f32.mrb[2].mxu0 }
 0x19b   :  { %v7141_v15 = vadd.f32 %v4848_v57, %v4768_v39  ;;  %v759_v52 = vpop.f32.mrb[3].mxu0 }
 0x19c   :  { %v4068_v55 = vadd.f32 %v4065_v35, %v4064_v27  ;;  %v7143_v9 = vadd.f32 %v759_v52, %v342_v51 }
 0x19d   :  { %v4067_v2 = vmul.f32 %v7141_v15, %v7141_v15 }
 0x19e   :  { %v4066_v12 = vmul.f32 %v7143_v9, %v7143_v9 }
 0x1a0   :  { %v4069_v33 = vadd.f32 %v4068_v55, %v4066_v12 }
 0x1a2   :  { %v4070_v41 = vadd.f32 %v4069_v33, %v4067_v2 }
 0x1a4   :  { %v4071_v45 = vrot.slane %v4070_v41, 4 }
 0x1a6   :  { %v4072_v56 = vadd.f32 %v4071_v45, %v4070_v41 }
 0x1a8   :  { %v4073_v63 = vrot.slane %v4072_v56, 2 }
 0x1aa   :  { %v4074_v37 = vadd.f32 %v4073_v63, %v4072_v56 }
 0x1ac   :  { %v4075_v53 = vrot.slane %v4074_v37, 1 }
 0x1ae   :  { %v4076_v34 = vadd.f32 %v4075_v53, %v4074_v37 }
 0x1b0   :  { %v4905_v47 = vpop.f32.mrb[4].mxu1  ;;  %5827 = vrsqrt.f32 %v4076_v34  ;;  %vm4079_vm8 = vcmp.eq.f32.partialorder %v4076_v34, inf  ;;  %v4082_v59 = vand.u32 2147483648, %v4076_v34  ;;  %vm4081_vm5 = vcmp.eq.f32.partialorder %v4076_v34, 0.0 }
 0x1b1   :  { %v4085_v36 = vmul.f32 %v4905_v47, %v4905_v47  ;;  %v1394_v50 = vpop.f32.mrb[5].mxu1 }
 0x1b2   :  { %v4084_v7 = vmul.f32 %v1394_v50, %v1394_v50 }
 0x1b4   :  { %v4088_v54 = vadd.f32 %v4085_v36, %v4084_v7 }
 0x1b5   :  { %v7149_v60 = vpop.f32.mrb[6].mxu1 }
 0x1b6   :  { %v7151_v32 = vpop.f32.mrb[7].mxu1  ;;  %v4087_v13 = vmul.f32 %v7149_v60, %v7149_v60 }
 0x1b7   :  { %v4086_v8 = vmul.f32 %v7151_v32, %v7151_v32 }
 0x1b9   :  { %v4089_v0 = vadd.f32 %v4088_v54, %v4086_v8 }
 0x1ba   :  { %v5828_v4 = vpop.eup %5827 }
 0x1bb   :  { %v4090_v1 = vadd.f32 %v4089_v0, %v4087_v13  ;;  %v4078_v10 = vmul.f32 %v5828_v4, %v4076_v34 }
 0x1bd   :  { %v4091_v31 = vrot.slane %v4090_v1, 4  ;;  %v4080_v61 = vsel %vm4079_vm8, %v4076_v34, %v4078_v10 }
 0x1be   :  { %v4083_v3 = vsel %vm4081_vm5, %v4082_v59, %v4080_v61 }
 0x1bf   :  { %v4092_v24 = vadd.f32 %v4091_v31, %v4090_v1 }
 0x1c1   :  { %v4093_v46 = vrot.slane %v4092_v24, 2 }
 0x1c3   :  { %v4094_v21 = vadd.f32 %v4093_v46, %v4092_v24 }
 0x1c5   :  { %v4095_v22 = vrot.slane %v4094_v21, 1 }
 0x1c7   :  { %v4096_v30 = vadd.f32 %v4095_v22, %v4094_v21 }
 0x1c9   :  { %5829 = vrsqrt.f32 %v4096_v30  ;;  %vm4099_vm2 = vcmp.eq.f32.partialorder %v4096_v30, inf  ;;  %v4102_v16 = vand.u32 2147483648, %v4096_v30  ;;  %vm4101_vm4 = vcmp.eq.f32.partialorder %v4096_v30, 0.0 }
 0x1d3   :  { %v5830_v14 = vpop.eup %5829 }
 0x1d4   :  { %v4098_v6 = vmul.f32 %v5830_v14, %v4096_v30 }
 0x1d6   :  { %v4100_v11 = vsel %vm4099_vm2, %v4096_v30, %v4098_v6 }
 0x1d7   :  { %v4103_v19 = vsel %vm4101_vm4, %v4102_v16, %v4100_v11 }
 0x1d8   :  { %v7157_v17 = vadd.f32 %v4103_v19, %v4083_v3 }
 0x1ef   :  { %v7159_v29 = vpop.f32.mrb[4].mxu0 }
 0x1f0   :  { %v4154_v44 = vmul.f32 %v7159_v29, %v7159_v29  ;;  %v7163_v25 = vpop.f32.mrb[5].mxu0 }
 0x1f1   :  { %v4153_v26 = vmul.f32 %v7163_v25, %v7163_v25 }
 0x1f3   :  { %v4157_v58 = vadd.f32 %v4154_v44, %v4153_v26  ;;  %v7167_v43 = vpop.f32.mrb[6].mxu0 }
 0x1f4   :  { %v7169_v40 = vpop.f32.mrb[7].mxu0  ;;  %v4156_v48 = vmul.f32 %v7167_v43, %v7167_v43 }
 0x1f5   :  { %v4155_v28 = vmul.f32 %v7169_v40, %v7169_v40 }
 0x1f7   :  { %v4158_v23 = vadd.f32 %v4157_v58, %v4155_v28 }
 0x1f9   :  { %v4159_v5 = vadd.f32 %v4158_v23, %v4156_v48 }
 0x1fb   :  { %v4160_v3 = vrot.slane %v4159_v5, 4 }
 0x1fd   :  { %v4161_v19 = vadd.f32 %v4160_v3, %v4159_v5 }
 0x1ff   :  { %v4162_v26 = vrot.slane %v4161_v19, 2 }
 0x209   :  { %v5025_v18 = vpop.f32.mrb[8].mxu1 }
 0x20a   :  { %v4105_v38 = vmul.f32 %v5025_v18, %v5025_v18  ;;  %v4125_v39 = vmul.f32 %v7133_v49, %v5025_v18  ;;  %v4129_v51 = vsub.f32 %v5025_v18, %v7133_v49  ;;  %v2076_v62 = vpop.f32.mrb[9].mxu1 }
 0x20b   :  { %v4104_v42 = vmul.f32 %v2076_v62, %v2076_v62  ;;  %v4124_v35 = vmul.f32 %v7135_v20, %v2076_v62  ;;  %v4128_v27 = vsub.f32 %v2076_v62, %v7135_v20 }
 0x20c   :  { %v4133_v57 = vmul.f32 %v4905_v47, %v4129_v51  ;;  %v4163_v51 = vadd.f32 %v4162_v26, %v4161_v19 }
 0x20d   :  { %v4108_v52 = vadd.f32 %v4105_v38, %v4104_v42  ;;  %v4132_v55 = vmul.f32 %v4128_v27, %v1394_v50 }
 0x20e   :  { %v4137_v12 = vadd.f32 %v4133_v57, %v4125_v39  ;;  %v5028_v2 = vpop.f32.mrb[10].mxu1  ;;  %v4164_v27 = vrot.slane %v4163_v51, 1 }
 0x20f   :  { %v4136_v33 = vadd.f32 %v4132_v55, %v4124_v35  ;;  %v4127_v41 = vmul.f32 %v7141_v15, %v5028_v2  ;;  %v4131_v45 = vsub.f32 %v5028_v2, %v7141_v15  ;;  %v2088_v56 = vpop.f32.mrb[11].mxu1  ;;  %v4107_v20 = vmul.f32 %v5028_v2, %v5028_v2 }
 0x210   :  { %v4106_v36 = vmul.f32 %v2088_v56, %v2088_v56  ;;  %v4126_v49 = vmul.f32 %v7143_v9, %v2088_v56  ;;  %v4130_v7 = vsub.f32 %v2088_v56, %v7143_v9 }
 0x211   :  { %v4140_v63 = vadd.f32 %v4137_v12, %v4136_v33  ;;  %v4135_v54 = vmul.f32 %v7149_v60, %v4131_v45  ;;  %v7192_v12 = vadd.f32 %v4164_v27, %v4163_v51 }
 0x212   :  { %v4109_v47 = vadd.f32 %v4108_v52, %v4106_v36  ;;  %v4134_v50 = vmul.f32 %v4130_v7, %v7151_v32 }
 0x213   :  { %v4139_v37 = vadd.f32 %v4135_v54, %v4127_v41  ;;  %vm4168_vm9 = vcmp.eq.f32.partialorder %v7192_v12, inf  ;;  %vm4170_vm11 = vcmp.eq.f32.partialorder %v7192_v12, 0.0 }
 0x214   :  { %v4110_v8 = vadd.f32 %v4109_v47, %v4107_v20  ;;  %v4138_v13 = vadd.f32 %v4134_v50, %v4126_v49 }
 0x216   :  { %v4111_v0 = vrot.slane %v4110_v8, 4  ;;  %v4141_v53 = vadd.f32 %v4140_v63, %v4138_v13 }
 0x218   :  { %v4112_v1 = vadd.f32 %v4111_v0, %v4110_v8  ;;  %v4142_v15 = vadd.f32 %v4141_v53, %v4139_v37 }
 0x21a   :  { %v4113_v31 = vrot.slane %v4112_v1, 2  ;;  %v4143_v34 = vrot.slane %v4142_v15, 4 }
 0x21c   :  { %v4114_v24 = vadd.f32 %v4113_v31, %v4112_v1  ;;  %v4144_v46 = vadd.f32 %v4143_v34, %v4142_v15 }
 0x21e   :  { %v4115_v21 = vrot.slane %v4114_v24, 1  ;;  %v4145_v22 = vrot.slane %v4144_v46, 2 }
 0x220   :  { %v4116_v9 = vadd.f32 %v4115_v21, %v4114_v24  ;;  %v4146_v60 = vadd.f32 %v4145_v22, %v4144_v46 }
 0x222   :  { %5831 = vrsqrt.f32 %v4116_v9  ;;  %v4147_v30 = vrot.slane %v4146_v60, 1  ;;  %vm4119_vm6 = vcmp.eq.f32.partialorder %v4116_v9, inf  ;;  %v4122_v14 = vand.u32 2147483648, %v4116_v9 }
 0x223   :  { %vm4121_vm7 = vcmp.eq.f32.partialorder %v4116_v9, 0.0  ;;  %5833 = vrsqrt.f32 %v7192_v12 }
 0x224   :  { %v4148_v32 = vadd.f32 %v4147_v30, %v4146_v60 }
 0x226   :  { %v7188_v16 = vmul.f32 2.0, %v4148_v32 }
 0x22c   :  { %v5832_v4 = vpop.eup %5831 }
 0x22d   :  { %v4118_v10 = vmul.f32 %v5832_v4, %v4116_v9 }
 0x22f   :  { %v4120_v61 = vsel %vm4119_vm6, %v4116_v9, %v4118_v10 }
 0x230   :  { %v4123_v6 = vsel %vm4121_vm7, %v4122_v14, %v4120_v61  ;;  %v5834_v61 = vpop.eup %5833 }
 0x231   :  { %v7186_v59 = vadd.f32 %v7157_v17, %v4123_v6 }
 0x233   :  { %v4152_v11 = vsub.f32 %v7186_v59, %v7188_v16 }
 0x23b   :  { %v5205_v44 = vpop.f32.mrb[12].mxu1 }
 0x23c   :  { %v4174_v58 = vmul.f32 %v5205_v44, %v5205_v44  ;;  %v3360_v28 = vpop.f32.mrb[13].mxu1 }
 0x23d   :  { %v4173_v48 = vmul.f32 %v3360_v28, %v3360_v28  ;;  %v5308_v23 = vpop.f32.mrb[10].mxu0 }
 0x23e   :  { %v3958_v18 = vpop.f32.mrb[11].mxu0 }
 0x23f   :  { %v4177_v38 = vadd.f32 %v4174_v58, %v4173_v48  ;;  %v5208_v39 = vpop.f32.mrb[14].mxu1 }
 0x240   :  { %v3372_v62 = vpop.f32.mrb[15].mxu1  ;;  %v4176_v42 = vmul.f32 %v5208_v39, %v5208_v39 }
 0x241   :  { %v4175_v17 = vmul.f32 %v3372_v62, %v3372_v62 }
 0x243   :  { %v4178_v35 = vadd.f32 %v4177_v38, %v4175_v17 }
 0x245   :  { %v4179_v57 = vadd.f32 %v4178_v35, %v4176_v42 }
 0x247   :  { %v4180_v52 = vrot.slane %v4179_v57, 4  ;;  %v5325_v55 = vpop.f32.mrb[8].mxu0 }
 0x248   :  { %v4194_v5 = vmul.f32 %v5325_v55, %v5325_v55  ;;  %v4214_v2 = vmul.f32 %v5325_v55, %v7159_v29  ;;  %v4218_v33 = vsub.f32 %v5325_v55, %v7159_v29  ;;  %v4042_v41 = vpop.f32.mrb[9].mxu0 }
 0x249   :  { %v4181_v45 = vadd.f32 %v4180_v52, %v4179_v57  ;;  %v4193_v56 = vmul.f32 %v4042_v41, %v4042_v41  ;;  %v4213_v36 = vmul.f32 %v4042_v41, %v7163_v25  ;;  %v4217_v49 = vsub.f32 %v4042_v41, %v7163_v25  ;;  %v5328_v7 = vpop.f32.mrb[16].mxu1 }
 0x24a   :  { %v4222_v63 = vmul.f32 %v5205_v44, %v4218_v33  ;;  %v5689_v54 = vadd.f32 %v5328_v7, %v5308_v23  ;;  %v4054_v20 = vpop.f32.mrb[17].mxu1 }
 0x24b   :  { %v4182_v47 = vrot.slane %v4181_v45, 2  ;;  %v4197_v50 = vadd.f32 %v4194_v5, %v4193_v56  ;;  %v4221_v37 = vmul.f32 %v4217_v49, %v3360_v28  ;;  %v5690_v8 = vadd.f32 %v4054_v20, %v3958_v18 }
 0x24c   :  { %v4226_v13 = vadd.f32 %v4222_v63, %v4214_v2  ;;  %v4216_v0 = vmul.f32 %v5689_v54, %v7167_v43  ;;  %v4220_v29 = vsub.f32 %v5689_v54, %v7167_v43  ;;  %v4196_v21 = vmul.f32 %v5689_v54, %v5689_v54 }
 0x24d   :  { %v4183_v53 = vadd.f32 %v4182_v47, %v4181_v45  ;;  %v4225_v1 = vadd.f32 %v4221_v37, %v4213_v36  ;;  %v4195_v15 = vmul.f32 %v5690_v8, %v5690_v8  ;;  %v4215_v25 = vmul.f32 %v5690_v8, %v7169_v40 }
 0x24e   :  { %v4224_v31 = vmul.f32 %v5208_v39, %v4220_v29  ;;  %v4219_v34 = vsub.f32 %v5690_v8, %v7169_v40  ;;  %v4167_v40 = vmul.f32 %v5834_v61, %v7192_v12  ;;  %v4171_v39 = vand.u32 2147483648, %v7192_v12 }
 0x24f   :  { %v4184_v24 = vrot.slane %v4183_v53, 1  ;;  %v4229_v46 = vadd.f32 %v4226_v13, %v4225_v1  ;;  %v4198_v9 = vadd.f32 %v4197_v50, %v4195_v15 }
 0x250   :  { %v4228_v22 = vadd.f32 %v4224_v31, %v4216_v0  ;;  %v4223_v60 = vmul.f32 %v4219_v34, %v3372_v62  ;;  %v4169_v23 = vsel %vm4168_vm9, %v7192_v12, %v4167_v40 }
 0x251   :  { %v4185_v30 = vadd.f32 %v4184_v24, %v4183_v53  ;;  %v4199_v4 = vadd.f32 %v4198_v9, %v4196_v21  ;;  %v4172_v17 = vsel %vm4170_vm11, %v4171_v39, %v4169_v23 }
 0x252   :  { %v4227_v10 = vadd.f32 %v4223_v60, %v4215_v25 }
 0x253   :  { %v4200_v43 = vrot.slane %v4199_v4, 4  ;;  %5835 = vrsqrt.f32 %v4185_v30  ;;  %vm4188_vm10 = vcmp.eq.f32.partialorder %v4185_v30, inf  ;;  %v4191_v51 = vand.u32 2147483648, %v4185_v30 }
 0x254   :  { %v4230_v32 = vadd.f32 %v4229_v46, %v4227_v10  ;;  %vm4190_vm12 = vcmp.eq.f32.partialorder %v4185_v30, 0.0 }
 0x255   :  { %v4201_v14 = vadd.f32 %v4200_v43, %v4199_v4 }
 0x256   :  { %v4231_v6 = vadd.f32 %v4230_v32, %v4228_v22 }
 0x257   :  { %v4202_v3 = vrot.slane %v4201_v14, 2 }
 0x258   :  { %v4232_v19 = vrot.slane %v4231_v6, 4 }
 0x259   :  { %v4203_v44 = vadd.f32 %v4202_v3, %v4201_v14 }
 0x25a   :  { %v4233_v26 = vadd.f32 %v4232_v19, %v4231_v6 }
 0x25b   :  { %v4204_v58 = vrot.slane %v4203_v44, 1 }
 0x25c   :  { %v4234_v38 = vrot.slane %v4233_v26, 2 }
 0x25d   :  { %v5836_v28 = vpop.eup %5835  ;;  %v4205_v48 = vadd.f32 %v4204_v58, %v4203_v44 }
 0x25e   :  { %v4187_v18 = vmul.f32 %v5836_v28, %v4185_v30  ;;  %v4235_v35 = vadd.f32 %v4234_v38, %v4233_v26 }
 0x25f   :  { %5837 = vrsqrt.f32 %v4205_v48  ;;  %vm4208_vm14 = vcmp.eq.f32.partialorder %v4205_v48, inf  ;;  %v4211_v2 = vand.u32 2147483648, %v4205_v48  ;;  %vm4210_vm0 = vcmp.eq.f32.partialorder %v4205_v48, 0.0 }
 0x260   :  { %v4189_v62 = vsel %vm4188_vm10, %v4185_v30, %v4187_v18  ;;  %v4236_v57 = vrot.slane %v4235_v35, 1 }
 0x261   :  { %v4192_v42 = vsel %vm4190_vm12, %v4191_v51, %v4189_v62 }
 0x262   :  { %v4238_v27 = vadd.f32 %v4192_v42, %v4172_v17  ;;  %v4237_v5 = vadd.f32 %v4236_v57, %v4235_v35 }
 0x264   :  { %v4240_v56 = vmul.f32 2.0, %v4237_v5 }
 0x269   :  { %v5838_v52 = vpop.eup %5837 }
 0x26a   :  { %v4207_v55 = vmul.f32 %v5838_v52, %v4205_v48 }
 0x26c   :  { %v4209_v33 = vsel %vm4208_vm14, %v4205_v48, %v4207_v55 }
 0x26d   :  { %v4212_v41 = vsel %vm4210_vm0, %v4211_v2, %v4209_v33 }
 0x26e   :  { %v4239_v45 = vadd.f32 %v4238_v27, %v4212_v41 }
 0x270   :  { %v4241_v12 = vsub.f32 %v4239_v45, %v4240_v56 }
 0x272   :  { %v4243_v36 = vsel %vm4242_vm15, %v4152_v11, %v4241_v12 }
 0x273   :  { %4244 = vst [vmem:[#allocation2] sm:$0x3] %v4243_v36 }
 0x274   :  { %5850 = shalt.err (!%p5847_p4)
}
 0x275   :  { %s5851_s17 = scalar_lea.hbm %s7226_s3, 32 }
 0x276   :  { %p5852_p5 = scmp.ne.s32.totalorder %s7226_s3, %s5851_s17  ;;  %p5855_p6 = scmp.lt.u32.totalorder %s5851_s17, %s7226_s3 }
 0x278   :  { %p5857_p7 = pnand %p5855_p6, %p5852_p5 }
 0x27a   :  { %5860 = shalt.err (!%p5857_p7)
}
 0x27b   :  { %4254 = dma.vmem_to_hbm [thread:$0]  %s4252_s13, 32, %s7226_s3, [#allocation3]  }
 0x27c   :  { %5861 = dma.done.wait [#allocation3], 32  }
 0x27d   :  { %5862 = vsyncadd [#allocation3], 4294967264 }
 0x27e   :  { %4258 = vsyncpa [#allocation3], 1 }

</bundles_post_ra>
